<compile_context>
chip_gen: v5e
topology: v5e:2x2
jax: 0.10.0
libtpu: 0.0.40
codegen_flags: <defaults>
</compile_context>

<pallas_src>
import functools

import jax
import jax.numpy as jnp
import numpy as np
from jax import lax
from jax.experimental import pallas as pl
from jax.experimental.pallas import tpu as pltpu


# ---------------------------------------------------------------------------
# Fused kernel: conv (single im2col matmul) + ReLU + 3x3/s2 max-pool windows
# ---------------------------------------------------------------------------
def _fused_conv_relu_pool_kernel(x_ref, w_ref, o_ref, *, btile, oh, ow, kh, kw, ph):
    """x_ref: (Btile, Hp, Wp, Cin)   padded NHWC input tile (compute dtype)
       w_ref: (KH*KW*Cin, OCp)       flattened, lane-padded weights (compute dtype)
       o_ref: (Btile, PH, OW-2, OCp) column-windowed pooled output (f32)."""
    cin = x_ref.shape[-1]
    ocp = o_ref.shape[-1]
    m = btile * oh * ow

    # ---- in-VMEM im2col: 9 contiguous tap slices -> (M, KH*KW*Cin) slab ----
    # Each tap reshape only folds (Btile, OH) into the sublane axis (OW is a multiple
    # of 8 in the tested config -> tile-preserving); the lane-axis concat rides the XLU.
    taps = []
    for ky in range(kh):
        for kx in range(kw):
            tap = x_ref[:, ky:ky + oh, kx:kx + ow, :]          # (Btile, OH, OW, Cin)
            taps.append(tap.reshape(m, cin))
    slab = jnp.concatenate(taps, axis=1)                       # (M, KH*KW*Cin)

    # ---- ONE MXU matmul owns the conv accumulation; fused ReLU ----
    y = jnp.dot(slab, w_ref[...], preferred_element_type=jnp.float32)   # (M, OCp) f32
    y = jnp.maximum(y, 0.0)
    y = y.reshape(btile, oh, ow, ocp)                          # split of sublane axis

    # ---- MaxPool2d(3, stride=2, pad=0): rows via major-dim slices (cheap) ----
    rwin = jnp.maximum(jnp.maximum(y[:, 0:oh - 2], y[:, 1:oh - 1]), y[:, 2:oh])
    if rwin.shape[1] < 2 * ph:   # odd OH: zero pad row, never picked by parity select
        pad = jnp.zeros((btile, 2 * ph - rwin.shape[1], ow, ocp), rwin.dtype)
        rwin = jnp.concatenate([rwin, pad], axis=1)
    rdown = rwin[:, :2 * ph].reshape(btile, ph, 2, ow, ocp)[:, :, 0]   # (Bt,PH,OW,OCp)

    # ---- columns: 3-tap running max via 2 sublane-shifted slices (XLU) ----
    # The stride-2 column selection happens in the wrapper on the tiny pooled tensor,
    # so the kernel store stays lane-dense (OCp = 128) and mostly full-sublane.
    cwin = jnp.maximum(jnp.maximum(rdown[:, :, 0:ow - 2], rdown[:, :, 1:ow - 1]),
                       rdown[:, :, 2:ow])                      # (Bt, PH, OW-2, OCp)
    o_ref[...] = cwin.astype(o_ref.dtype)


# ---------------------------------------------------------------------------
# One-time weight repack (amortized at parameter-init time, not per forward)
# ---------------------------------------------------------------------------
def prepare_weights(w_oihw, compute_dtype=jnp.bfloat16):
    """OIHW -> (KH*KW*Cin, OCp): rows ordered (ky, kx, ci) to match the in-kernel
    im2col slab, out-channels zero-padded to a lane-dense multiple of 128."""
    oc, cin, kh, kw = w_oihw.shape
    ocp = ((oc + 127) // 128) * 128
    w = jnp.transpose(w_oihw, (2, 3, 1, 0)).astype(compute_dtype)   # (KH, KW, Cin, OC)
    w = w.reshape(kh * kw * cin, oc)
    return jnp.pad(w, ((0, 0), (0, ocp - oc)))


def _pick_batch_tile(n):
    """Largest divisor of n that is <= 8 while keeping >= 2 grid steps when n >= 2,
    so v7x's two TensorCores both receive work and per-step VMEM stays small."""
    best = 1
    for d in range(1, min(n, 8) + 1):
        if n % d == 0 and (n < 2 or n // d >= 2):
            best = d
    return best


# ---------------------------------------------------------------------------
# BaseConv forward
# ---------------------------------------------------------------------------
@functools.partial(jax.jit, static_argnames=("oc", "kh", "kw", "stride", "padding"))
def base_conv_forward(x_nchw, w_flat, *, oc, kh, kw, stride, padding):
    n, cin, h, w_sp = x_nchw.shape
    if stride != 1:
        # TODO(synk): conv stride > 1 tap extraction (strided slices) not implemented;
        # the BaseConv instance under test uses stride=1.
        raise NotImplementedError("BaseConv Pallas kernel: stride != 1 not implemented")

    oh = (h + 2 * padding - kh) // stride + 1
    ow = (w_sp + 2 * padding - kw) // stride + 1
    assert oh >= 3 and ow >= 3, "MaxPool2d(3, stride=2, pad=0) needs conv output >= 3x3"
    ph = (oh - 3) // 2 + 1
    ocp = w_flat.shape[1]
    hp, wp = h + 2 * padding, w_sp + 2 * padding
    compute_dtype = w_flat.dtype
    btile = _pick_batch_tile(n)

    # NCHW -> NHWC + spatial zero pad: one small fused XLA copy of the input (the
    # per-call weight repack of the previous version is gone).
    x = jnp.transpose(x_nchw, (0, 2, 3, 1)).astype(compute_dtype)
    x = jnp.pad(x, ((0, 0), (padding, padding), (padding, padding), (0, 0)))

    kernel = functools.partial(_fused_conv_relu_pool_kernel,
                               btile=btile, oh=oh, ow=ow, kh=kh, kw=kw, ph=ph)

    pooled_win = pl.pallas_call(
        kernel,
        out_shape=jax.ShapeDtypeStruct((n, ph, ow - 2, ocp), jnp.float32),
        grid=(n // btile,),
        in_specs=[
            pl.BlockSpec((btile, hp, wp, cin), lambda i: (i, 0, 0, 0)),
            pl.BlockSpec((kh * kw * cin, ocp), lambda i: (0, 0)),
        ],
        out_specs=pl.BlockSpec((btile, ph, ow - 2, ocp), lambda i: (i, 0, 0, 0)),
        compiler_params=pltpu.CompilerParams(
            dimension_semantics=("parallel",)),   # batch steps shard over v7x's 2 TCs
    )(x, w_flat)

    # Tiny epilogue on the pooled tensor only: stride-2 column pick, drop OC lane
    # padding, NHWC -> NCHW.
    return jnp.transpose(pooled_win[:, :, ::2, :oc], (0, 3, 1, 2))


# ---------------------------------------------------------------------------
# Pure-JAX reference (correctness check)
# ---------------------------------------------------------------------------
def base_conv_reference(x_nchw, w_oihw, *, stride, padding):
    y = lax.conv_general_dilated(
        x_nchw, w_oihw,
        window_strides=(stride, stride),
        padding=[(padding, padding), (padding, padding)],
        dimension_numbers=("NCHW", "OIHW", "NCHW"))
    y = jnp.maximum(y, 0.0)
    return lax.reduce_window(
        y, -jnp.inf, lax.max,
        window_dimensions=(1, 1, 3, 3),
        window_strides=(1, 1, 2, 2),
        padding="VALID")


if __name__ == "__main__":
    # BaseConv(in_channels=4, out_channels=8, ker_size=3, stride=1, padding=1, bia=False)
    in_channels, out_channels, ker_size, stride, padding = 4, 8, 3, 1, 1
    N, H, W = 2, 16, 16

    key = jax.random.PRNGKey(0)
    kx_, kw_ = jax.random.split(key)
    x = jax.random.normal(kx_, (N, in_channels, H, W), dtype=jnp.float32)
    w = jax.random.normal(
        kw_, (out_channels, in_channels, ker_size, ker_size), dtype=jnp.float32) * 0.1

    ref = base_conv_reference(x, w, stride=stride, padding=padding)

    # f32 operands: tight correctness check.
    w_flat_f32 = prepare_weights(w, compute_dtype=jnp.float32)
    out_f32 = base_conv_forward(x, w_flat_f32, oc=out_channels, kh=ker_size,
                                kw=ker_size, stride=stride, padding=padding)
    out_f32 = jax.block_until_ready(out_f32)
    np.testing.assert_allclose(np.asarray(out_f32), np.asarray(ref),
                               rtol=1e-5, atol=1e-5)
    assert out_f32.shape == (N, out_channels, (H - 1) // 2, (W - 1) // 2)  # (2, 8, 7, 7)

    # bf16 operands (preferred on v6e/v7x; MXU accumulation stays f32): loose check.
    w_flat_bf16 = prepare_weights(w, compute_dtype=jnp.bfloat16)
    out_bf16 = base_conv_forward(x, w_flat_bf16, oc=out_channels, kh=ker_size,
                                 kw=ker_size, stride=stride, padding=padding)
    out_bf16 = jax.block_until_ready(out_bf16)
    np.testing.assert_allclose(np.asarray(out_bf16), np.asarray(ref),
                               rtol=5e-2, atol=5e-2)

    print("KERNEL_OK")
</pallas_src>

<mosaic_0001>
module attributes {stable_mosaic.version = 11 : i64} {
  func.func @_fused_conv_relu_pool_kernel(%arg0: i32, %arg1: memref<1x18x18x4xf32, #tpu.memory_space<vmem>>, %arg2: memref<36x128xf32, #tpu.memory_space<vmem>>, %arg3: memref<1x7x14x128xf32, #tpu.memory_space<vmem>>) attributes {dimension_semantics = [#tpu.dimension_semantics<parallel>], iteration_bounds = array<i64: 2>, scalar_prefetch = 0 : i64, scratch_operands = 0 : i64, tpu.core_type = #tpu.core_type<tc>, window_params = [{transform_indices = @transform_0, window_bounds = array<i64: 1, 18, 18, 4>}, {pipeline_mode = #tpu.pipeline_mode<synchronous>, transform_indices = @transform_1, window_bounds = array<i64: 36, 128>}, {transform_indices = @transform_2, window_bounds = array<i64: 1, 7, 14, 128>}]} {
    %c0 = arith.constant 0 : index
    %c0_0 = arith.constant 0 : index
    %c0_1 = arith.constant 0 : index
    %c0_2 = arith.constant 0 : index
    %0 = vector.load %arg1[%c0, %c0_0, %c0_1, %c0_2] : memref<1x18x18x4xf32, #tpu.memory_space<vmem>>, vector<1x16x16x4xf32>
    %1 = vector.shape_cast %0 : vector<1x16x16x4xf32> to vector<256x4xf32>
    %c0_3 = arith.constant 0 : index
    %c0_4 = arith.constant 0 : index
    %c1 = arith.constant 1 : index
    %c0_5 = arith.constant 0 : index
    %2 = vector.load %arg1[%c0_3, %c0_4, %c1, %c0_5] : memref<1x18x18x4xf32, #tpu.memory_space<vmem>>, vector<1x16x16x4xf32>
    %3 = vector.shape_cast %2 : vector<1x16x16x4xf32> to vector<256x4xf32>
    %c0_6 = arith.constant 0 : index
    %c0_7 = arith.constant 0 : index
    %c2 = arith.constant 2 : index
    %c0_8 = arith.constant 0 : index
    %4 = vector.load %arg1[%c0_6, %c0_7, %c2, %c0_8] : memref<1x18x18x4xf32, #tpu.memory_space<vmem>>, vector<1x16x16x4xf32>
    %5 = vector.shape_cast %4 : vector<1x16x16x4xf32> to vector<256x4xf32>
    %c0_9 = arith.constant 0 : index
    %c1_10 = arith.constant 1 : index
    %c0_11 = arith.constant 0 : index
    %c0_12 = arith.constant 0 : index
    %6 = vector.load %arg1[%c0_9, %c1_10, %c0_11, %c0_12] : memref<1x18x18x4xf32, #tpu.memory_space<vmem>>, vector<1x16x16x4xf32>
    %7 = vector.shape_cast %6 : vector<1x16x16x4xf32> to vector<256x4xf32>
    %c0_13 = arith.constant 0 : index
    %c1_14 = arith.constant 1 : index
    %c1_15 = arith.constant 1 : index
    %c0_16 = arith.constant 0 : index
    %8 = vector.load %arg1[%c0_13, %c1_14, %c1_15, %c0_16] : memref<1x18x18x4xf32, #tpu.memory_space<vmem>>, vector<1x16x16x4xf32>
    %9 = vector.shape_cast %8 : vector<1x16x16x4xf32> to vector<256x4xf32>
    %c0_17 = arith.constant 0 : index
    %c1_18 = arith.constant 1 : index
    %c2_19 = arith.constant 2 : index
    %c0_20 = arith.constant 0 : index
    %10 = vector.load %arg1[%c0_17, %c1_18, %c2_19, %c0_20] : memref<1x18x18x4xf32, #tpu.memory_space<vmem>>, vector<1x16x16x4xf32>
    %11 = vector.shape_cast %10 : vector<1x16x16x4xf32> to vector<256x4xf32>
    %c0_21 = arith.constant 0 : index
    %c2_22 = arith.constant 2 : index
    %c0_23 = arith.constant 0 : index
    %c0_24 = arith.constant 0 : index
    %12 = vector.load %arg1[%c0_21, %c2_22, %c0_23, %c0_24] : memref<1x18x18x4xf32, #tpu.memory_space<vmem>>, vector<1x16x16x4xf32>
    %13 = vector.shape_cast %12 : vector<1x16x16x4xf32> to vector<256x4xf32>
    %c0_25 = arith.constant 0 : index
    %c2_26 = arith.constant 2 : index
    %c1_27 = arith.constant 1 : index
    %c0_28 = arith.constant 0 : index
    %14 = vector.load %arg1[%c0_25, %c2_26, %c1_27, %c0_28] : memref<1x18x18x4xf32, #tpu.memory_space<vmem>>, vector<1x16x16x4xf32>
    %15 = vector.shape_cast %14 : vector<1x16x16x4xf32> to vector<256x4xf32>
    %c0_29 = arith.constant 0 : index
    %c2_30 = arith.constant 2 : index
    %c2_31 = arith.constant 2 : index
    %c0_32 = arith.constant 0 : index
    %16 = vector.load %arg1[%c0_29, %c2_30, %c2_31, %c0_32] : memref<1x18x18x4xf32, #tpu.memory_space<vmem>>, vector<1x16x16x4xf32>
    %17 = vector.shape_cast %16 : vector<1x16x16x4xf32> to vector<256x4xf32>
    %18 = tpu.concatenate %1, %3, %5, %7, %9, %11, %13, %15, %17 in 1 : vector<256x4xf32>, vector<256x4xf32>, vector<256x4xf32>, vector<256x4xf32>, vector<256x4xf32>, vector<256x4xf32>, vector<256x4xf32>, vector<256x4xf32>, vector<256x4xf32> -> vector<256x36xf32>
    %c0_33 = arith.constant 0 : index
    %c0_34 = arith.constant 0 : index
    %19 = vector.load %arg2[%c0_33, %c0_34] : memref<36x128xf32, #tpu.memory_space<vmem>>, vector<36x128xf32>
    %cst = arith.constant dense<0.000000e+00> : vector<256x128xf32>
    %20 = tpu.matmul %18, %19, %cst {dimension_numbers = #tpu.dot_dimension_numbers<[1], [0], [0], [1], [0, 0, 1, 1], [], []>} : vector<256x36xf32>, vector<36x128xf32>, vector<256x128xf32> -> vector<256x128xf32>
    %cst_35 = arith.constant 0.000000e+00 : f32
    %21 = vector.broadcast %cst_35 : f32 to vector<256x128xf32>
    %22 = arith.maximumf %20, %21 : vector<256x128xf32>
    %23 = vector.shape_cast %22 : vector<256x128xf32> to vector<1x16x16x128xf32>
    %24 = vector.extract_strided_slice %23 {offsets = [0, 0, 0, 0], sizes = [1, 14, 16, 128], strides = [1, 1, 1, 1]} : vector<1x16x16x128xf32> to vector<1x14x16x128xf32>
    %25 = vector.extract_strided_slice %23 {offsets = [0, 1, 0, 0], sizes = [1, 14, 16, 128], strides = [1, 1, 1, 1]} : vector<1x16x16x128xf32> to vector<1x14x16x128xf32>
    %26 = arith.maximumf %24, %25 : vector<1x14x16x128xf32>
    %27 = vector.extract_strided_slice %23 {offsets = [0, 2, 0, 0], sizes = [1, 14, 16, 128], strides = [1, 1, 1, 1]} : vector<1x16x16x128xf32> to vector<1x14x16x128xf32>
    %28 = arith.maximumf %26, %27 : vector<1x14x16x128xf32>
    %29 = vector.shape_cast %28 : vector<1x14x16x128xf32> to vector<1x7x2x16x128xf32>
    %30 = vector.extract_strided_slice %29 {offsets = [0, 0, 0, 0, 0], sizes = [1, 7, 1, 16, 128], strides = [1, 1, 1, 1, 1]} : vector<1x7x2x16x128xf32> to vector<1x7x1x16x128xf32>
    %31 = vector.shape_cast %30 : vector<1x7x1x16x128xf32> to vector<1x7x16x128xf32>
    %32 = vector.extract_strided_slice %31 {offsets = [0, 0, 0, 0], sizes = [1, 7, 14, 128], strides = [1, 1, 1, 1]} : vector<1x7x16x128xf32> to vector<1x7x14x128xf32>
    %33 = vector.extract_strided_slice %31 {offsets = [0, 0, 1, 0], sizes = [1, 7, 14, 128], strides = [1, 1, 1, 1]} : vector<1x7x16x128xf32> to vector<1x7x14x128xf32>
    %34 = arith.maximumf %32, %33 : vector<1x7x14x128xf32>
    %35 = vector.extract_strided_slice %31 {offsets = [0, 0, 2, 0], sizes = [1, 7, 14, 128], strides = [1, 1, 1, 1]} : vector<1x7x16x128xf32> to vector<1x7x14x128xf32>
    %36 = arith.maximumf %34, %35 : vector<1x7x14x128xf32>
    %c0_36 = arith.constant 0 : index
    %c0_37 = arith.constant 0 : index
    %c0_38 = arith.constant 0 : index
    %c0_39 = arith.constant 0 : index
    %37 = vector.load %arg3[%c0_36, %c0_37, %c0_38, %c0_39] : memref<1x7x14x128xf32, #tpu.memory_space<vmem>>, vector<1x7x14x128xf32>
    tpu.vector_store %arg3[%c0_36, %c0_37, %c0_38, %c0_39], %36 {strides = array<i32>} : memref<1x7x14x128xf32, #tpu.memory_space<vmem>>, vector<1x7x14x128xf32>,
    return
  }
  func.func @transform_0(%arg0: i32) -> (i32, i32, i32, i32) {
    %c0_i32 = arith.constant 0 : i32
    %c0_i32_0 = arith.constant 0 : i32
    %c0_i32_1 = arith.constant 0 : i32
    %c0_i32_2 = arith.constant 0 : i32
    return %arg0, %c0_i32, %c0_i32_0, %c0_i32_1 : i32, i32, i32, i32
  }
  func.func @transform_1(%arg0: i32) -> (i32, i32) {
    %c0_i32 = arith.constant 0 : i32
    %c0_i32_0 = arith.constant 0 : i32
    %c0_i32_1 = arith.constant 0 : i32
    return %c0_i32, %c0_i32_0 : i32, i32
  }
  func.func @transform_2(%arg0: i32) -> (i32, i32, i32, i32) {
    %c0_i32 = arith.constant 0 : i32
    %c0_i32_0 = arith.constant 0 : i32
    %c0_i32_1 = arith.constant 0 : i32
    %c0_i32_2 = arith.constant 0 : i32
    return %arg0, %c0_i32, %c0_i32_0, %c0_i32_1 : i32, i32, i32, i32
  }
}

</mosaic_0001>

<bundles_post_ra>
// kernel: base_conv_forward.1
= control target key start
LH: loop header
LB: loop body
LE: loop exit
PB: predicated region body
PF: predicated region fallthrough
CT: control target
= control target key end

     0   :  { %s2485_s9 = smov 0   ;;  %s4260_s0 = inlined_call_operand.vmem [shape: f32[2,18,18,4], index: 0, kind: input, shape index: {}]   ;;  %s4261_s1 = inlined_call_operand.vmem [shape: f32[36,128], index: 1, kind: input, shape index: {}]   ;;  %s4262_s2 = inlined_call_operand.vmem [shape: f32[2,7,14,128], index: 2, kind: output, shape index: {}]  }
   0x1 LB: > { %s2180_s10 = sadd.s32 4294967295, %s2460_s9   ;;  %p2184_p0 = scmp.ge.s32.totalorder %s2460_s9, 1  ;;  %s2460_s9 = sphi %s2485_s9, %s12_s9  }
   0x2   : > { %p112_p1 = scmp.lt.s32.totalorder %s2460_s9, 3 }
   0x4   : > { %p113_p2 = pnand %p2184_p0, %p112_p1 }
   0x6   : > { %116 = sbr.rel (%p113_p2) target bundleno = 947 (0x3b3), region = 28 }
   0xb   : > { %p134_p3 = scmp.lt.s32.totalorder %s2180_s10, 1  ;;  %s2462_s15 = smov 4   ;;  %vm1458_vm0 = vcmask 31744   ;;  %vm1491_vm1 = vcmask 64512   ;;  %vm1524_vm2 = vcmask 97280   ;;  %vm1557_vm3 = vcmask 130048  }
   0xc   : > { %s2463_s16 = smov 8   ;;  %s2464_s17 = smov 12   ;;  %vm1590_vm4 = vcmask 162816   ;;  %vm1623_vm5 = vcmask 195584   ;;  %vm1824_vm6 = vcmask 1043456   ;;  %vm1656_vm7 = vcmask 228352  }
   0xd   : > { %s4522_s10 = smov (!%p134_p3, %s2180_s10), 1  ;;  %s2465_s18 = smov 16   ;;  %vm1689_vm8 = vcmask 261120   ;;  %vm1727_vm9 = vcmask 293888   ;;  %vm2011_vm10 = vcmask 1046528   ;;  %vm2061_vm11 = vcmask 1045504  }
   0xe   : > { %s2429_s11 = smul.u32 432, %s4522_s10  ;;  %s2466_s19 = smov 20  }
   0xf   : > { %s2467_s20 = smov 24   ;;  %s2468_s21 = smov 28  }
  0x10   : > { %s2499_s14 = scalar_lea.vmem %s4260_s0, %s2429_s11  ;;  %s2469_s22 = smov 32  }
  0x11   : > { %v2502_v0 = vld [vmem:[%s2499_s14 + $0x31] sm:$0xff]  ;;  %v2505_v1 = vld [vmem:[%s2499_s14 + $0x19] sm:$0xff]  ;;  %v176_v2 = vld [vmem:[%s2499_s14 + $0x1] sm:$0xff]  ;;  %s2430_s5 = smul.u32 112, %s4522_s10 }
  0x12   : > { %474 = vrot.lane.b32.xlu2 %v2502_v0, %s2462_s15  ;;  %470 = vrot.lane.b32.xlu1 %v2505_v1, %s2462_s15  ;;  %v2514_v3 = vld [vmem:[%s2499_s14 + $0x39] sm:$0xff]  ;;  %v2517_v4 = vld [vmem:[%s2499_s14 + $0x21] sm:$0xff] }
  0x13   : > { %466 = vrot.lane.b32.xlu0 %v176_v2, %s2462_s15  ;;  %v177_v5 = vld [vmem:[%s2499_s14 + $0x9] sm:$0xff]  ;;  %v2526_v6 = vld [vmem:[%s2499_s14 + $0x61] sm:$0xff]  ;;  %v2529_v7 = vld [vmem:[%s2499_s14 + $0x51] sm:$0xff]  ;;  %s4203_s8 = scalar_lea.vmem %s4262_s2, %s2430_s5 }
  0x14   : > { %v2532_v8 = vld [vmem:[%s2499_s14 + $0x49] sm:$0xff]  ;;  %v2541_v9 = vld [vmem:[%s2499_s14 + $0x81] sm:$0xff]  ;;  %v2544_v10 = vld [vmem:[%s2499_s14 + $0x79] sm:$0xff] }
  0x15   : > { %v2547_v11 = vld [vmem:[%s2499_s14 + $0x69] sm:$0xff]  ;;  %v2559_v13 = vld [vmem:[%s2499_s14 + $0x99] sm:$0xff]  ;;  %v2562_v14 = vld [vmem:[%s2499_s14 + $0x91] sm:$0xff] }
  0x16   : > { %v2556_v12 = vld [vmem:[%s2499_s14 + $0xa9] sm:$0xff]  ;;  %v2574_v16 = vld [vmem:[%s2499_s14 + $0xc1] sm:$0xff]  ;;  %v2577_v17 = vld [vmem:[%s2499_s14 + $0xb1] sm:$0xff] }
  0x17   : > { %v2571_v15 = vld [vmem:[%s2499_s14 + $0xc9] sm:$0xff]  ;;  %v2586_v18 = vld [vmem:[%s2499_s14 + $0xf1] sm:$0xff]  ;;  %v2589_v19 = vld [vmem:[%s2499_s14 + $0xe1] sm:$0xff] }
  0x18   : > { %v2592_v20 = vld [vmem:[%s2499_s14 + $0xd9] sm:$0xff]  ;;  %v2601_v21 = vld [vmem:[%s2499_s14 + $0x111] sm:$0xff]  ;;  %v2604_v22 = vld [vmem:[%s2499_s14 + $0x109] sm:$0xff] }
  0x19   : > { %v2607_v23 = vld [vmem:[%s2499_s14 + $0xf9] sm:$0xff]  ;;  %v2619_v25 = vld [vmem:[%s2499_s14 + $0x129] sm:$0xff]  ;;  %v2622_v26 = vld [vmem:[%s2499_s14 + $0x121] sm:$0xff] }
  0x1a   : > { %476 = vrot.lane.b32.xlu2 %v2514_v3, %s2462_s15  ;;  %472 = vrot.lane.b32.xlu1 %v2517_v4, %s2462_s15  ;;  %v2616_v24 = vld [vmem:[%s2499_s14 + $0x139] sm:$0xff]  ;;  %v2634_v28 = vld [vmem:[%s2499_s14 + $0x151] sm:$0xff] }
  0x1b   : > { %468 = vrot.lane.b32.xlu0 %v177_v5, %s2462_s15  ;;  %v2631_v27 = vld [vmem:[%s2499_s14 + $0x159] sm:$0xff]  ;;  %v2637_v29 = vld [vmem:[%s2499_s14 + $0x141] sm:$0xff]  ;;  %v2647_v31 = vld [vmem:[%s2499_s14 + $0x171] sm:$0xff] }
  0x1c   : > { %v208_v30 = vld [vmem:[%s2499_s14 + $0x2] sm:$0xff]  ;;  %v2661_v34 = vld [vmem:[%s2499_s14 + $0x1a] sm:$0xff]  ;;  %v209_v35 = vld [vmem:[%s2499_s14 + $0xa] sm:$0xff] }
  0x1d   : > { %v2650_v32 = vld [vmem:[%s2499_s14 + $0x169] sm:$0xff]  ;;  %v2675_v38 = vld [vmem:[%s2499_s14 + $0x3a] sm:$0xff]  ;;  %v2678_v39 = vld [vmem:[%s2499_s14 + $0x32] sm:$0xff] }
  0x1e   : > { %v2658_v33 = vld [vmem:[%s2499_s14 + $0x22] sm:$0xff]  ;;  %v2672_v37 = vld [vmem:[%s2499_s14 + $0x4a] sm:$0xff]  ;;  %v2695_v43 = vld [vmem:[%s2499_s14 + $0x52] sm:$0xff] }
  0x1f   : > { %v2689_v41 = vld [vmem:[%s2499_s14 + $0x6a] sm:$0xff]  ;;  %v2692_v42 = vld [vmem:[%s2499_s14 + $0x62] sm:$0xff]  ;;  %v2706_v45 = vld [vmem:[%s2499_s14 + $0x92] sm:$0xff] }
  0x20   : > { %v2709_v46 = vld [vmem:[%s2499_s14 + $0x82] sm:$0xff]  ;;  %v2712_v47 = vld [vmem:[%s2499_s14 + $0x7a] sm:$0xff]  ;;  %v2727_v51 = vld [vmem:[%s2499_s14 + $0xb2] sm:$0xff] }
  0x21   : > { %v2730_v52 = vld [vmem:[%s2499_s14 + $0xaa] sm:$0xff]  ;;  %v2733_v53 = vld [vmem:[%s2499_s14 + $0x9a] sm:$0xff]  ;;  %v2754_v59 = vld [vmem:[%s2499_s14 + $0xc2] sm:$0xff] }
  0x22   : > { %482 = vrot.lane.b32.xlu2 %v2526_v6, %s2462_s15  ;;  %480 = vrot.lane.b32.xlu1 %v2529_v7, %s2462_s15  ;;  %v2748_v57 = vld [vmem:[%s2499_s14 + $0xda] sm:$0xff]  ;;  %v2751_v58 = vld [vmem:[%s2499_s14 + $0xca] sm:$0xff] }
  0x23   : > { %478 = vrot.lane.b32.xlu0 %v2532_v8, %s2462_s15  ;;  %v2769_v63 = vld [vmem:[%s2499_s14 + $0xfa] sm:$0xff]  ;;  %v2772_v2 = vld [vmem:[%s2499_s14 + $0xf2] sm:$0xff]  ;;  %v2775_v5 = vld [vmem:[%s2499_s14 + $0xe2] sm:$0xff] }
  0x2a   : > { %488 = vrot.lane.b32.xlu2 %v2541_v9, %s2462_s15  ;;  %486 = vrot.lane.b32.xlu1 %v2544_v10, %s2462_s15 }
  0x2b   : > { %484 = vrot.lane.b32.xlu0 %v2547_v11, %s2462_s15 }
  0x32   : > { %494 = vrot.lane.b32.xlu2 %v2556_v12, %s2462_s15  ;;  %492 = vrot.lane.b32.xlu1 %v2559_v13, %s2462_s15 }
  0x33   : > { %490 = vrot.lane.b32.xlu0 %v2562_v14, %s2462_s15 }
  0x3a   : > { %500 = vrot.lane.b32.xlu2 %v2571_v15, %s2462_s15  ;;  %498 = vrot.lane.b32.xlu1 %v2574_v16, %s2462_s15 }
  0x3b   : > { %496 = vrot.lane.b32.xlu0 %v2577_v17, %s2462_s15 }
  0x42   : > { %506 = vrot.lane.b32.xlu2 %v2586_v18, %s2462_s15  ;;  %504 = vrot.lane.b32.xlu1 %v2589_v19, %s2462_s15 }
  0x43   : > { %502 = vrot.lane.b32.xlu0 %v2592_v20, %s2462_s15 }
  0x4a   : > { %512 = vrot.lane.b32.xlu2 %v2601_v21, %s2462_s15  ;;  %510 = vrot.lane.b32.xlu1 %v2604_v22, %s2462_s15 }
  0x4b   : > { %508 = vrot.lane.b32.xlu0 %v2607_v23, %s2462_s15 }
  0x52   : > { %518 = vrot.lane.b32.xlu2 %v2616_v24, %s2462_s15  ;;  %516 = vrot.lane.b32.xlu1 %v2619_v25, %s2462_s15 }
  0x53   : > { %514 = vrot.lane.b32.xlu0 %v2622_v26, %s2462_s15 }
  0x5a   : > { %524 = vrot.lane.b32.xlu2 %v2631_v27, %s2462_s15  ;;  %522 = vrot.lane.b32.xlu1 %v2634_v28, %s2462_s15 }
  0x5b   : > { %520 = vrot.lane.b32.xlu0 %v2637_v29, %s2462_s15 }
  0x62   : > { %594 = vrot.lane.b32.xlu2 %v208_v30, %s2463_s16  ;;  %528 = vrot.lane.b32.xlu1 %v2647_v31, %s2462_s15 }
  0x63   : > { %526 = vrot.lane.b32.xlu0 %v2650_v32, %s2462_s15 }
  0x6a   : > { %600 = vrot.lane.b32.xlu2 %v2658_v33, %s2463_s16  ;;  %598 = vrot.lane.b32.xlu1 %v2661_v34, %s2463_s16 }
  0x6b   : > { %596 = vrot.lane.b32.xlu0 %v209_v35, %s2463_s16 }
  0x6c   : > { %v2669_v36 = vpop.permute.xlu2 %474 }
  0x6d   : > { %4305 = vst [vmem:[#allocation2_spill] sm:$0xff] %v2669_v36  ;;  %v2814_v36 = vld [vmem:[%s2499_s14 + $0x13a] sm:$0xff] }
  0x72   : > { %606 = vrot.lane.b32.xlu2 %v2672_v37, %s2463_s16  ;;  %604 = vrot.lane.b32.xlu1 %v2675_v38, %s2463_s16 }
  0x73   : > { %602 = vrot.lane.b32.xlu0 %v2678_v39, %s2463_s16 }
  0x74   : > { %v2686_v40 = vpop.permute.xlu2 %476 }
  0x75   : > { %4306 = vst [vmem:[#allocation3_spill] sm:$0xff] %v2686_v40  ;;  %v2796_v40 = vld [vmem:[%s2499_s14 + $0x10a] sm:$0xff] }
  0x7a   : > { %612 = vrot.lane.b32.xlu2 %v2689_v41, %s2463_s16  ;;  %610 = vrot.lane.b32.xlu1 %v2692_v42, %s2463_s16 }
  0x7b   : > { %608 = vrot.lane.b32.xlu0 %v2695_v43, %s2463_s16 }
  0x7c   : > { %v2703_v44 = vpop.permute.xlu2 %482 }
  0x7d   : > { %4307 = vst [vmem:[#allocation4_spill] sm:$0xff] %v2703_v44  ;;  %v2793_v44 = vld [vmem:[%s2499_s14 + $0x112] sm:$0xff] }
  0x82   : > { %618 = vrot.lane.b32.xlu2 %v2706_v45, %s2463_s16  ;;  %616 = vrot.lane.b32.xlu1 %v2709_v46, %s2463_s16 }
  0x83   : > { %614 = vrot.lane.b32.xlu0 %v2712_v47, %s2463_s16 }
  0x84   : > { %v2720_v48 = vpop.permute.xlu2 %488  ;;  %v2722_v49 = vpop.permute.xlu1 %470 }
  0x85   : > { %4308 = vst [vmem:[#allocation5_spill] sm:$0xff] %v2720_v48  ;;  %v2724_v50 = vpop.permute.xlu0 %466  ;;  %v2790_v48 = vld [vmem:[%s2499_s14 + $0x122] sm:$0xff] }
  0x86   : > { %4309 = vst [vmem:[#allocation6_spill] sm:$0xff] %v2722_v49  ;;  %v2853_v49 = vld [vmem:[%s2499_s14 + $0x172] sm:$0xff] }
  0x87   : > { %4310 = vst [vmem:[#allocation7_spill] sm:$0xff] %v2724_v50 }
  0x88   : > { %4333 = vst [vmem:[#allocation30_spill] sm:$0xff] %v2853_v49 }
  0x8a   : > { %624 = vrot.lane.b32.xlu2 %v2727_v51, %s2463_s16  ;;  %622 = vrot.lane.b32.xlu1 %v2730_v52, %s2463_s16 }
  0x8b   : > { %620 = vrot.lane.b32.xlu0 %v2733_v53, %s2463_s16 }
  0x8c   : > { %v2741_v54 = vpop.permute.xlu2 %494  ;;  %v2743_v55 = vpop.permute.xlu1 %472 }
  0x8d   : > { %4311 = vst [vmem:[#allocation8_spill] sm:$0xff] %v2741_v54  ;;  %v2745_v56 = vpop.permute.xlu0 %468  ;;  %v2838_v54 = vld [vmem:[%s2499_s14 + $0x152] sm:$0xff] }
  0x8e   : > { %4312 = vst [vmem:[#allocation9_spill] sm:$0xff] %v2743_v55  ;;  %v2856_v55 = vld [vmem:[%s2499_s14 + $0x18] sm:$0xff] }
  0x8f   : > { %4313 = vst [vmem:[#allocation10_spill] sm:$0xff] %v2745_v56  ;;  %v2817_v56 = vld [vmem:[%s2499_s14 + $0x12a] sm:$0xff] }
  0x90   : > { %4329 = vst [vmem:[#allocation26_spill] sm:$0xff] %v2838_v54 }
  0x91   : > { %4334 = vst [vmem:[#allocation31_spill] sm:$0xff] %v2856_v55 }
  0x92   : > { %630 = vrot.lane.b32.xlu2 %v2748_v57, %s2463_s16  ;;  %628 = vrot.lane.b32.xlu1 %v2751_v58, %s2463_s16 }
  0x93   : > { %626 = vrot.lane.b32.xlu0 %v2754_v59, %s2463_s16 }
  0x94   : > { %v2762_v60 = vpop.permute.xlu2 %500  ;;  %v2764_v61 = vpop.permute.xlu1 %480 }
  0x95   : > { %4314 = vst [vmem:[#allocation11_spill] sm:$0xff] %v2762_v60  ;;  %v2766_v62 = vpop.permute.xlu0 %478  ;;  %v2832_v60 = vld [vmem:[%s2499_s14 + $0x16a] sm:$0xff] }
  0x96   : > { %4315 = vst [vmem:[#allocation12_spill] sm:$0xff] %v2764_v61  ;;  %v2811_v61 = vld [vmem:[%s2499_s14 + $0x142] sm:$0xff] }
  0x97   : > { %4316 = vst [vmem:[#allocation13_spill] sm:$0xff] %v2766_v62 }
  0x98   : > { %4323 = vst [vmem:[#allocation20_spill] sm:$0xff] %v2811_v61 }
  0x99   : > { %4327 = vst [vmem:[#allocation24_spill] sm:$0xff] %v2832_v60 }
  0x9a   : > { %636 = vrot.lane.b32.xlu2 %v2769_v63, %s2463_s16  ;;  %634 = vrot.lane.b32.xlu1 %v2772_v2, %s2463_s16 }
  0x9b   : > { %632 = vrot.lane.b32.xlu0 %v2775_v5, %s2463_s16 }
  0x9c   : > { %v2783_v30 = vpop.permute.xlu2 %506  ;;  %v2785_v35 = vpop.permute.xlu1 %486 }
  0x9d   : > { %4317 = vst [vmem:[#allocation14_spill] sm:$0xff] %v2783_v30  ;;  %v2787_v50 = vpop.permute.xlu0 %484 }
  0x9e   : > { %4318 = vst [vmem:[#allocation15_spill] sm:$0xff] %v2785_v35 }
  0x9f   : > { %4319 = vst [vmem:[#allocation16_spill] sm:$0xff] %v2787_v50 }
  0xa2   : > { %642 = vrot.lane.b32.xlu2 %v2790_v48, %s2463_s16  ;;  %640 = vrot.lane.b32.xlu1 %v2793_v44, %s2463_s16 }
  0xa3   : > { %638 = vrot.lane.b32.xlu0 %v2796_v40, %s2463_s16 }
  0xa4   : > { %v2804_v62 = vpop.permute.xlu2 %512  ;;  %v2806_v50 = vpop.permute.xlu1 %492 }
  0xa5   : > { %4320 = vst [vmem:[#allocation17_spill] sm:$0xff] %v2804_v62  ;;  %v2808_v35 = vpop.permute.xlu0 %490 }
  0xa6   : > { %4321 = vst [vmem:[#allocation18_spill] sm:$0xff] %v2806_v50  ;;  %v2835_v50 = vld [vmem:[%s2499_s14 + $0x15a] sm:$0xff] }
  0xa7   : > { %4322 = vst [vmem:[#allocation19_spill] sm:$0xff] %v2808_v35 }
  0xa8   : > { %4328 = vst [vmem:[#allocation25_spill] sm:$0xff] %v2835_v50 }
  0xaa   : > { %648 = vrot.lane.b32.xlu2 %v2811_v61, %s2463_s16  ;;  %646 = vrot.lane.b32.xlu1 %v2814_v36, %s2463_s16  ;;  %v149_v61 = vld [vmem:[%s2499_s14 + $0x38] sm:$0xff] }
  0xab   : > { %644 = vrot.lane.b32.xlu0 %v2817_v56, %s2463_s16 }
  0xac   : > { %v2825_v62 = vpop.permute.xlu2 %518  ;;  %v2827_v35 = vpop.permute.xlu1 %498 }
  0xad   : > { %4324 = vst [vmem:[#allocation21_spill] sm:$0xff] %v2825_v62  ;;  %v2829_v30 = vpop.permute.xlu0 %496 }
  0xae   : > { %4325 = vst [vmem:[#allocation22_spill] sm:$0xff] %v2827_v35 }
  0xaf   : > { %4326 = vst [vmem:[#allocation23_spill] sm:$0xff] %v2829_v30 }
  0xb2   : > { %654 = vrot.lane.b32.xlu2 %v2832_v60, %s2463_s16  ;;  %652 = vrot.lane.b32.xlu1 %v2835_v50, %s2463_s16  ;;  %v2859_v60 = vld [vmem:[%s2499_s14 + $0x20] sm:$0xff]  ;;  %v2878_v50 = vld [vmem:[%s2499_s14 + $0x30] sm:$0xff] }
  0xb3   : > { %650 = vrot.lane.b32.xlu0 %v2838_v54, %s2463_s16  ;;  %4335 = vst [vmem:[#allocation32_spill] sm:$0xff] %v2859_v60  ;;  %v2875_v54 = vld [vmem:[%s2499_s14 + $0x48] sm:$0xff] }
  0xb4   : > { %v2846_v62 = vpop.permute.xlu2 %524  ;;  %v2848_v35 = vpop.permute.xlu1 %504  ;;  %4339 = vst [vmem:[#allocation36_spill] sm:$0xff] %v2875_v54 }
  0xb5   : > { %4330 = vst [vmem:[#allocation27_spill] sm:$0xff] %v2846_v62  ;;  %v2850_v30 = vpop.permute.xlu0 %502 }
  0xb6   : > { %4331 = vst [vmem:[#allocation28_spill] sm:$0xff] %v2848_v35 }
  0xb7   : > { %4332 = vst [vmem:[#allocation29_spill] sm:$0xff] %v2850_v30 }
  0xb8   : > { %4340 = vst [vmem:[#allocation37_spill] sm:$0xff] %v2878_v50 }
  0xba   : > { %724 = vrot.lane.b32.xlu2 %v2859_v60, %s2464_s17  ;;  %722 = vrot.lane.b32.xlu1 %v2856_v55, %s2464_s17  ;;  %v152_v60 = vld [vmem:[%s2499_s14 + $0x60] sm:$0xff] }
  0xbb   : > { %656 = vrot.lane.b32.xlu0 %v2853_v49, %s2463_s16  ;;  %v2896_v49 = vld [vmem:[%s2499_s14 + $0x50] sm:$0xff] }
  0xbc   : > { %v2867_v62 = vpop.permute.xlu2 %594  ;;  %v2869_v30 = vpop.permute.xlu1 %510  ;;  %4345 = vst [vmem:[#allocation42_spill] sm:$0xff] %v2896_v49 }
  0xbd   : > { %4336 = vst [vmem:[#allocation33_spill] sm:$0xff] %v2867_v62  ;;  %v2871_v35 = vpop.permute.xlu0 %508 }
  0xbe   : > { %4337 = vst [vmem:[#allocation34_spill] sm:$0xff] %v2869_v30  ;;  %v2893_v30 = vld [vmem:[%s2499_s14 + $0x68] sm:$0xff] }
  0xbf   : > { %4338 = vst [vmem:[#allocation35_spill] sm:$0xff] %v2871_v35 }
  0xc0   : > { %4344 = vst [vmem:[#allocation41_spill] sm:$0xff] %v2893_v30 }
  0xc2   : > { %730 = vrot.lane.b32.xlu2 %v2875_v54, %s2464_s17  ;;  %728 = vrot.lane.b32.xlu1 %v149_v61, %s2464_s17 }
  0xc3   : > { %726 = vrot.lane.b32.xlu0 %v2878_v50, %s2464_s17 }
  0xc4   : > { %v2885_v62 = vpop.permute.xlu2 %600  ;;  %v2887_v55 = vpop.permute.xlu1 %516 }
  0xc5   : > { %4341 = vst [vmem:[#allocation38_spill] sm:$0xff] %v2885_v62  ;;  %v2889_v35 = vpop.permute.xlu0 %514  ;;  %v2914_v62 = vld [vmem:[%s2499_s14 + $0x78] sm:$0xff] }
  0xc6   : > { %4342 = vst [vmem:[#allocation39_spill] sm:$0xff] %v2887_v55  ;;  %v2911_v55 = vld [vmem:[%s2499_s14 + $0x90] sm:$0xff] }
  0xc7   : > { %4343 = vst [vmem:[#allocation40_spill] sm:$0xff] %v2889_v35  ;;  %v155_v35 = vld [vmem:[%s2499_s14 + $0x80] sm:$0xff] }
  0xc8   : > { %4349 = vst [vmem:[#allocation46_spill] sm:$0xff] %v2911_v55 }
  0xc9   : > { %4350 = vst [vmem:[#allocation47_spill] sm:$0xff] %v2914_v62 }
  0xca   : > { %736 = vrot.lane.b32.xlu2 %v2893_v30, %s2464_s17  ;;  %734 = vrot.lane.b32.xlu1 %v152_v60, %s2464_s17  ;;  %v2928_v30 = vld [vmem:[%s2499_s14 + $0xa8] sm:$0xff] }
  0xcb   : > { %732 = vrot.lane.b32.xlu0 %v2896_v49, %s2464_s17  ;;  %4354 = vst [vmem:[#allocation51_spill] sm:$0xff] %v2928_v30  ;;  %v2934_v49 = vld [vmem:[%s2499_s14 + $0x98] sm:$0xff] }
  0xcc   : > { %v2903_v61 = vpop.permute.xlu2 %606  ;;  %v2905_v50 = vpop.permute.xlu1 %522  ;;  %4356 = vst [vmem:[#allocation53_spill] sm:$0xff] %v2934_v49 }
  0xcd   : > { %4346 = vst [vmem:[#allocation43_spill] sm:$0xff] %v2903_v61  ;;  %v2907_v54 = vpop.permute.xlu0 %520 }
  0xce   : > { %4347 = vst [vmem:[#allocation44_spill] sm:$0xff] %v2905_v50 }
  0xcf   : > { %4348 = vst [vmem:[#allocation45_spill] sm:$0xff] %v2907_v54  ;;  %v2931_v54 = vld [vmem:[%s2499_s14 + $0xb0] sm:$0xff] }
  0xd0   : > { %4355 = vst [vmem:[#allocation52_spill] sm:$0xff] %v2931_v54 }
  0xd2   : > { %742 = vrot.lane.b32.xlu2 %v2911_v55, %s2464_s17  ;;  %740 = vrot.lane.b32.xlu1 %v155_v35, %s2464_s17 }
  0xd3   : > { %738 = vrot.lane.b32.xlu0 %v2914_v62, %s2464_s17  ;;  %v2955_v62 = vld [vmem:[%s2499_s14 + $0xc0] sm:$0xff] }
  0xd4   : > { %v2921_v60 = vpop.permute.xlu2 %612  ;;  %v2923_v61 = vpop.permute.xlu1 %528  ;;  %4362 = vst [vmem:[#allocation59_spill] sm:$0xff] %v2955_v62 }
  0xd5   : > { %4351 = vst [vmem:[#allocation48_spill] sm:$0xff] %v2921_v60  ;;  %v2925_v50 = vpop.permute.xlu0 %526 }
  0xd6   : > { %4352 = vst [vmem:[#allocation49_spill] sm:$0xff] %v2923_v61  ;;  %v2952_v61 = vld [vmem:[%s2499_s14 + $0xd8] sm:$0xff] }
  0xd7   : > { %4353 = vst [vmem:[#allocation50_spill] sm:$0xff] %v2925_v50  ;;  %v2949_v50 = vld [vmem:[%s2499_s14 + $0xc8] sm:$0xff] }
  0xd8   : > { %4360 = vst [vmem:[#allocation57_spill] sm:$0xff] %v2949_v50 }
  0xd9   : > { %4361 = vst [vmem:[#allocation58_spill] sm:$0xff] %v2952_v61 }
  0xda   : > { %748 = vrot.lane.b32.xlu2 %v2931_v54, %s2464_s17  ;;  %746 = vrot.lane.b32.xlu1 %v2928_v30, %s2464_s17  ;;  %v2970_v54 = vld [vmem:[%s2499_s14 + $0xf0] sm:$0xff] }
  0xdb   : > { %744 = vrot.lane.b32.xlu0 %v2934_v49, %s2464_s17  ;;  %4366 = vst [vmem:[#allocation63_spill] sm:$0xff] %v2970_v54  ;;  %v2976_v49 = vld [vmem:[%s2499_s14 + $0xe0] sm:$0xff] }
  0xdc   : > { %v2942_v35 = vpop.permute.xlu2 %618  ;;  %v2944_v60 = vpop.permute.xlu1 %598  ;;  %4368 = vst [vmem:[#allocation65_spill] sm:$0xff] %v2976_v49 }
  0xdd   : > { %4357 = vst [vmem:[#allocation54_spill] sm:$0xff] %v2942_v35  ;;  %v2946_v55 = vpop.permute.xlu0 %596 }
  0xde   : > { %4358 = vst [vmem:[#allocation55_spill] sm:$0xff] %v2944_v60  ;;  %v2973_v60 = vld [vmem:[%s2499_s14 + $0xf8] sm:$0xff] }
  0xdf   : > { %4359 = vst [vmem:[#allocation56_spill] sm:$0xff] %v2946_v55 }
  0xe0   : > { %4367 = vst [vmem:[#allocation64_spill] sm:$0xff] %v2973_v60 }
  0xe2   : > { %754 = vrot.lane.b32.xlu2 %v2952_v61, %s2464_s17  ;;  %752 = vrot.lane.b32.xlu1 %v2949_v50, %s2464_s17  ;;  %v2991_v61 = vld [vmem:[%s2499_s14 + $0x110] sm:$0xff] }
  0xe3   : > { %750 = vrot.lane.b32.xlu0 %v2955_v62, %s2464_s17  ;;  %4372 = vst [vmem:[#allocation69_spill] sm:$0xff] %v2991_v61  ;;  %v2997_v62 = vld [vmem:[%s2499_s14 + $0x108] sm:$0xff] }
  0xe4   : > { %v2963_v35 = vpop.permute.xlu2 %624  ;;  %v2965_v55 = vpop.permute.xlu1 %604  ;;  %4374 = vst [vmem:[#allocation71_spill] sm:$0xff] %v2997_v62 }
  0xe5   : > { %4363 = vst [vmem:[#allocation60_spill] sm:$0xff] %v2963_v35  ;;  %v2967_v30 = vpop.permute.xlu0 %602  ;;  %v2994_v35 = vld [vmem:[%s2499_s14 + $0x120] sm:$0xff] }
  0xe6   : > { %4364 = vst [vmem:[#allocation61_spill] sm:$0xff] %v2965_v55 }
  0xe7   : > { %4365 = vst [vmem:[#allocation62_spill] sm:$0xff] %v2967_v30 }
  0xe8   : > { %4373 = vst [vmem:[#allocation70_spill] sm:$0xff] %v2994_v35 }
  0xea   : > { %760 = vrot.lane.b32.xlu2 %v2973_v60, %s2464_s17  ;;  %758 = vrot.lane.b32.xlu1 %v2970_v54, %s2464_s17  ;;  %v3012_v60 = vld [vmem:[%s2499_s14 + $0x138] sm:$0xff] }
  0xeb   : > { %756 = vrot.lane.b32.xlu0 %v2976_v49, %s2464_s17  ;;  %4378 = vst [vmem:[#allocation75_spill] sm:$0xff] %v3012_v60  ;;  %v3018_v49 = vld [vmem:[%s2499_s14 + $0x128] sm:$0xff] }
  0xec   : > { %v2984_v55 = vpop.permute.xlu2 %630  ;;  %v2986_v30 = vpop.permute.xlu1 %610  ;;  %4380 = vst [vmem:[#allocation77_spill] sm:$0xff] %v3018_v49 }
  0xed   : > { %4369 = vst [vmem:[#allocation66_spill] sm:$0xff] %v2984_v55  ;;  %v2988_v50 = vpop.permute.xlu0 %608  ;;  %v3015_v55 = vld [vmem:[%s2499_s14 + $0x140] sm:$0xff] }
  0xee   : > { %4370 = vst [vmem:[#allocation67_spill] sm:$0xff] %v2986_v30 }
  0xef   : > { %4371 = vst [vmem:[#allocation68_spill] sm:$0xff] %v2988_v50 }
  0xf0   : > { %4379 = vst [vmem:[#allocation76_spill] sm:$0xff] %v3015_v55 }
  0xf2   : > { %766 = vrot.lane.b32.xlu2 %v2994_v35, %s2464_s17  ;;  %764 = vrot.lane.b32.xlu1 %v2991_v61, %s2464_s17  ;;  %v3036_v35 = vld [vmem:[%s2499_s14 + $0x168] sm:$0xff] }
  0xf3   : > { %762 = vrot.lane.b32.xlu0 %v2997_v62, %s2464_s17  ;;  %4385 = vst [vmem:[#allocation82_spill] sm:$0xff] %v3036_v35  ;;  %v3039_v62 = vld [vmem:[%s2499_s14 + $0x150] sm:$0xff] }
  0xf4   : > { %v3005_v30 = vpop.permute.xlu2 %636  ;;  %v3007_v50 = vpop.permute.xlu1 %616  ;;  %4386 = vst [vmem:[#allocation83_spill] sm:$0xff] %v3039_v62 }
  0xf5   : > { %4375 = vst [vmem:[#allocation72_spill] sm:$0xff] %v3005_v30  ;;  %v3009_v54 = vpop.permute.xlu0 %614  ;;  %v3033_v30 = vld [vmem:[%s2499_s14 + $0x158] sm:$0xff] }
  0xf6   : > { %4376 = vst [vmem:[#allocation73_spill] sm:$0xff] %v3007_v50 }
  0xf7   : > { %4377 = vst [vmem:[#allocation74_spill] sm:$0xff] %v3009_v54 }
  0xf8   : > { %4384 = vst [vmem:[#allocation81_spill] sm:$0xff] %v3033_v30 }
  0xfa   : > { %772 = vrot.lane.b32.xlu2 %v3015_v55, %s2464_s17  ;;  %770 = vrot.lane.b32.xlu1 %v3012_v60, %s2464_s17  ;;  %v2218_v55 = vld [vmem:[%s2499_s14 + $0x188] sm:$0xff] }
  0xfb   : > { %768 = vrot.lane.b32.xlu0 %v3018_v49, %s2464_s17  ;;  %v3056_v49 = vld [vmem:[%s2499_s14 + $0x170] sm:$0xff] }
  0xfc   : > { %v3026_v50 = vpop.permute.xlu2 %642  ;;  %v3028_v54 = vpop.permute.xlu1 %622 }
  0xfd   : > { %4381 = vst [vmem:[#allocation78_spill] sm:$0xff] %v3026_v50  ;;  %v3030_v61 = vpop.permute.xlu0 %620  ;;  %v2217_v50 = vld [vmem:[%s2499_s14 + $0x180] sm:$0xff] }
  0xfe   : > { %4382 = vst [vmem:[#allocation79_spill] sm:$0xff] %v3028_v54 }
  0xff   : > { %4383 = vst [vmem:[#allocation80_spill] sm:$0xff] %v3030_v61 }
 0x102   : > { %778 = vrot.lane.b32.xlu2 %v3036_v35, %s2464_s17  ;;  %776 = vrot.lane.b32.xlu1 %v3033_v30, %s2464_s17 }
 0x103   : > { %774 = vrot.lane.b32.xlu0 %v3039_v62, %s2464_s17 }
 0x104   : > { %v3047_v60 = vpop.permute.xlu2 %648  ;;  %v3049_v54 = vpop.permute.xlu1 %628 }
 0x105   : > { %v3051_v61 = vpop.permute.xlu0 %626 }
 0x106   : > { %4387 = vst [vmem:[#allocation84_spill] sm:$0xff] %v3051_v61 }
 0x10a   : > { %784 = vrot.lane.b32.xlu2 %v2218_v55, %s2464_s17  ;;  %782 = vrot.lane.b32.xlu1 %v2217_v50, %s2464_s17 }
 0x10b   : > { %780 = vrot.lane.b32.xlu0 %v3056_v49, %s2464_s17 }
 0x10c   : > { %v3062_v30 = vpop.permute.xlu2 %654  ;;  %v3064_v62 = vpop.permute.xlu1 %634 }
 0x10d   : > { %v3066_v35 = vpop.permute.xlu0 %632 }
 0x112   : > { %854 = vrot.lane.b32.xlu2 %v2502_v0, %s2465_s18  ;;  %852 = vrot.lane.b32.xlu1 %v2517_v4, %s2465_s18 }
 0x113   : > { %850 = vrot.lane.b32.xlu0 %v2505_v1, %s2465_s18 }
 0x114   : > { %v3074_v50 = vpop.permute.xlu2 %724  ;;  %v3076_v55 = vpop.permute.xlu1 %640 }
 0x115   : > { %v3078_v61 = vpop.permute.xlu0 %638 }
 0x11a   : > { %860 = vrot.lane.b32.xlu2 %v2529_v7, %s2465_s18  ;;  %858 = vrot.lane.b32.xlu1 %v2532_v8, %s2465_s18 }
 0x11b   : > { %856 = vrot.lane.b32.xlu0 %v2514_v3, %s2465_s18 }
 0x11c   : > { %v3086_v0 = vpop.permute.xlu2 %730  ;;  %v3088_v4 = vpop.permute.xlu1 %646 }
 0x11d   : > { %v3090_v1 = vpop.permute.xlu0 %644 }
 0x122   : > { %866 = vrot.lane.b32.xlu2 %v2544_v10, %s2465_s18  ;;  %864 = vrot.lane.b32.xlu1 %v2547_v11, %s2465_s18 }
 0x123   : > { %862 = vrot.lane.b32.xlu0 %v2526_v6, %s2465_s18 }
 0x124   : > { %v3098_v7 = vpop.permute.xlu2 %736  ;;  %v3100_v8 = vpop.permute.xlu1 %652 }
 0x125   : > { %v3102_v3 = vpop.permute.xlu0 %650 }
 0x12a   : > { %872 = vrot.lane.b32.xlu2 %v2559_v13, %s2465_s18  ;;  %870 = vrot.lane.b32.xlu1 %v2562_v14, %s2465_s18 }
 0x12b   : > { %868 = vrot.lane.b32.xlu0 %v2541_v9, %s2465_s18 }
 0x12c   : > { %v3110_v10 = vpop.permute.xlu2 %742  ;;  %v3112_v11 = vpop.permute.xlu1 %722 }
 0x12d   : > { %4388 = vst [vmem:[#allocation85_spill] sm:$0xff] %v3110_v10  ;;  %v3114_v6 = vpop.permute.xlu0 %656  ;;  %v4421_v10 = vld [vmem:[#allocation77_spill] sm:$0xff] }
 0x12e   : > { %4389 = vst [vmem:[#allocation86_spill] sm:$0xff] %v3112_v11  ;;  %v3190_v11 = vld [vmem:[%s2499_s14 + $0x181] sm:$0xff] }
 0x12f   : > { %4396 = vst [vmem:[#allocation93_spill] sm:$0xff] %v3190_v11 }
 0x132   : > { %878 = vrot.lane.b32.xlu2 %v2574_v16, %s2465_s18  ;;  %876 = vrot.lane.b32.xlu1 %v2577_v17, %s2465_s18 }
 0x133   : > { %874 = vrot.lane.b32.xlu0 %v2556_v12, %s2465_s18 }
 0x134   : > { %v3122_v13 = vpop.permute.xlu2 %748  ;;  %v3124_v14 = vpop.permute.xlu1 %728 }
 0x135   : > { %v3126_v9 = vpop.permute.xlu0 %726 }
 0x13a   : > { %884 = vrot.lane.b32.xlu2 %v2589_v19, %s2465_s18  ;;  %882 = vrot.lane.b32.xlu1 %v2592_v20, %s2465_s18 }
 0x13b   : > { %880 = vrot.lane.b32.xlu0 %v2571_v15, %s2465_s18 }
 0x13c   : > { %v3134_v16 = vpop.permute.xlu2 %754  ;;  %v3136_v17 = vpop.permute.xlu1 %734 }
 0x13d   : > { %4390 = vst [vmem:[#allocation87_spill] sm:$0xff] %v3136_v17  ;;  %v3138_v12 = vpop.permute.xlu0 %732 }
 0x13e   : > { %4391 = vst [vmem:[#allocation88_spill] sm:$0xff] %v3138_v12  ;;  %v4415_v12 = vld [vmem:[#allocation71_spill] sm:$0xff] }
 0x142   : > { %890 = vrot.lane.b32.xlu2 %v2604_v22, %s2465_s18  ;;  %888 = vrot.lane.b32.xlu1 %v2607_v23, %s2465_s18 }
 0x143   : > { %886 = vrot.lane.b32.xlu0 %v2586_v18, %s2465_s18 }
 0x144   : > { %v3146_v19 = vpop.permute.xlu2 %760  ;;  %v3148_v20 = vpop.permute.xlu1 %740 }
 0x145   : > { %4392 = vst [vmem:[#allocation89_spill] sm:$0xff] %v3148_v20  ;;  %v3150_v15 = vpop.permute.xlu0 %738  ;;  %v2250_v20 = vld [vmem:[%s2499_s14 + $0x189] sm:$0xff] }
 0x146   : > { %4393 = vst [vmem:[#allocation90_spill] sm:$0xff] %v3150_v15 }
 0x14a   : > { %896 = vrot.lane.b32.xlu2 %v2619_v25, %s2465_s18  ;;  %894 = vrot.lane.b32.xlu1 %v2622_v26, %s2465_s18 }
 0x14b   : > { %892 = vrot.lane.b32.xlu0 %v2601_v21, %s2465_s18 }
 0x14c   : > { %v3158_v22 = vpop.permute.xlu2 %766  ;;  %v3160_v18 = vpop.permute.xlu1 %746 }
 0x14d   : > { %4394 = vst [vmem:[#allocation91_spill] sm:$0xff] %v3160_v18  ;;  %v3162_v23 = vpop.permute.xlu0 %744  ;;  %v4410_v18 = vld [vmem:[#allocation65_spill] sm:$0xff] }
 0x14e   : > { %4395 = vst [vmem:[#allocation92_spill] sm:$0xff] %v3162_v23  ;;  %v3312_v23 = vld [vmem:[%s2499_s14 + $0x182] sm:$0xff] }
 0x152   : > { %902 = vrot.lane.b32.xlu2 %v2634_v28, %s2465_s18  ;;  %900 = vrot.lane.b32.xlu1 %v2637_v29, %s2465_s18 }
 0x153   : > { %898 = vrot.lane.b32.xlu0 %v2616_v24, %s2465_s18 }
 0x154   : > { %v3170_v25 = vpop.permute.xlu2 %772  ;;  %v3172_v21 = vpop.permute.xlu1 %752 }
 0x155   : > { %v3174_v26 = vpop.permute.xlu0 %750 }
 0x15a   : > { %908 = vrot.lane.b32.xlu2 %v2647_v31, %s2465_s18  ;;  %906 = vrot.lane.b32.xlu1 %v2650_v32, %s2465_s18 }
 0x15b   : > { %904 = vrot.lane.b32.xlu0 %v2631_v27, %s2465_s18 }
 0x15c   : > { %v3182_v28 = vpop.permute.xlu2 %778  ;;  %v3184_v29 = vpop.permute.xlu1 %758 }
 0x15d   : > { %v3186_v24 = vpop.permute.xlu0 %756 }
 0x162   : > { %978 = vrot.lane.b32.xlu2 %v2661_v34, %s2466_s19  ;;  %912 = vrot.lane.b32.xlu1 %v2250_v20, %s2465_s18 }
 0x163   : > { %910 = vrot.lane.b32.xlu0 %v3190_v11, %s2465_s18 }
 0x164   : > { %v3197_v31 = vpop.permute.xlu2 %784  ;;  %v3199_v27 = vpop.permute.xlu1 %764 }
 0x165   : > { %v3201_v32 = vpop.permute.xlu0 %762 }
 0x16a   : > { %984 = vrot.lane.b32.xlu2 %v2675_v38, %s2466_s19  ;;  %982 = vrot.lane.b32.xlu1 %v2678_v39, %s2466_s19 }
 0x16b   : > { %980 = vrot.lane.b32.xlu0 %v2658_v33, %s2466_s19 }
 0x16c   : > { %v3209_v34 = vpop.permute.xlu2 %854  ;;  %v3211_v20 = vpop.permute.xlu1 %770 }
 0x16d   : > { %v3213_v11 = vpop.permute.xlu0 %768 }
 0x172   : > { %990 = vrot.lane.b32.xlu2 %v2692_v42, %s2466_s19  ;;  %988 = vrot.lane.b32.xlu1 %v2695_v43, %s2466_s19 }
 0x173   : > { %986 = vrot.lane.b32.xlu0 %v2672_v37, %s2466_s19 }
 0x174   : > { %v3221_v38 = vpop.permute.xlu2 %860  ;;  %v3223_v39 = vpop.permute.xlu1 %776 }
 0x175   : > { %4397 = vst [vmem:[#allocation94_spill] sm:$0xff] %v3221_v38  ;;  %v3225_v33 = vpop.permute.xlu0 %774 }
 0x17a   : > { %996 = vrot.lane.b32.xlu2 %v2709_v46, %s2466_s19  ;;  %994 = vrot.lane.b32.xlu1 %v2712_v47, %s2466_s19 }
 0x17b   : > { %992 = vrot.lane.b32.xlu0 %v2689_v41, %s2466_s19 }
 0x17c   : > { %v3233_v42 = vpop.permute.xlu2 %866  ;;  %v3235_v43 = vpop.permute.xlu1 %782 }
 0x17d   : > { %4398 = vst [vmem:[#allocation95_spill] sm:$0xff] %v3233_v42  ;;  %v3237_v37 = vpop.permute.xlu0 %780  ;;  %v4412_v42 = vld [vmem:[#allocation24_spill] sm:$0xff] }
 0x182   : > { %1002 = vrot.lane.b32.xlu2 %v2730_v52, %s2466_s19  ;;  %1000 = vrot.lane.b32.xlu1 %v2733_v53, %s2466_s19 }
 0x183   : > { %998 = vrot.lane.b32.xlu0 %v2706_v45, %s2466_s19 }
 0x184   : > { %v3245_v46 = vpop.permute.xlu2 %872  ;;  %v3247_v47 = vpop.permute.xlu1 %852 }
 0x185   : > { %4399 = vst [vmem:[#allocation96_spill] sm:$0xff] %v3245_v46  ;;  %v3249_v41 = vpop.permute.xlu0 %850 }
 0x186   : > { %4400 = vst [vmem:[#allocation97_spill] sm:$0xff] %v3249_v41  ;;  %v4405_v41 = vld [vmem:[#allocation25_spill] sm:$0xff] }
 0x187   : > { %4408 = vst [vmem:[#allocation25_spill] sm:$0xff] %v3312_v23 }
 0x18a   : > { %1008 = vrot.lane.b32.xlu2 %v2751_v58, %s2466_s19  ;;  %1006 = vrot.lane.b32.xlu1 %v2754_v59, %s2466_s19 }
 0x18b   : > { %1004 = vrot.lane.b32.xlu0 %v2727_v51, %s2466_s19 }
 0x18c   : > { %v3257_v52 = vpop.permute.xlu2 %878  ;;  %v3259_v53 = vpop.permute.xlu1 %858 }
 0x18d   : > { %v3261_v45 = vpop.permute.xlu0 %856 }
 0x192   : > { %1014 = vrot.lane.b32.xlu2 %v2772_v2, %s2466_s19  ;;  %1012 = vrot.lane.b32.xlu1 %v2775_v5, %s2466_s19 }
 0x193   : > { %1010 = vrot.lane.b32.xlu0 %v2748_v57, %s2466_s19 }
 0x194   : > { %v3269_v58 = vpop.permute.xlu2 %884  ;;  %v3271_v59 = vpop.permute.xlu1 %864 }
 0x195   : > { %v3273_v51 = vpop.permute.xlu0 %862 }
 0x196   : > { %4401 = vst [vmem:[#allocation98_spill] sm:$0xff] %v3273_v51  ;;  %v2283_v51 = vld [vmem:[%s2499_s14 + $0x30] sm:$0xff] }
 0x19a   : > { %1020 = vrot.lane.b32.xlu2 %v2793_v44, %s2466_s19  ;;  %1018 = vrot.lane.b32.xlu1 %v2796_v40, %s2466_s19 }
 0x19b   : > { %1016 = vrot.lane.b32.xlu0 %v2769_v63, %s2466_s19 }
 0x19c   : > { %v3281_v2 = vpop.permute.xlu2 %890  ;;  %v3283_v5 = vpop.permute.xlu1 %870 }
 0x19d   : > { %4402 = vst [vmem:[#allocation99_spill] sm:$0xff] %v3283_v5  ;;  %v3285_v57 = vpop.permute.xlu0 %868 }
 0x19e   : > { %4403 = vst [vmem:[#allocation100_spill] sm:$0xff] %v3285_v57  ;;  %v4406_v57 = vld [vmem:[#allocation26_spill] sm:$0xff] }
 0x1a2   : > { %1026 = vrot.lane.b32.xlu2 %v2814_v36, %s2466_s19  ;;  %1024 = vrot.lane.b32.xlu1 %v2817_v56, %s2466_s19  ;;  %v4407_v36 = vld [vmem:[#allocation20_spill] sm:$0xff] }
 0x1a3   : > { %1022 = vrot.lane.b32.xlu0 %v2790_v48, %s2466_s19 }
 0x1a4   : > { %v3293_v40 = vpop.permute.xlu2 %896  ;;  %v3295_v44 = vpop.permute.xlu1 %876 }
 0x1a5   : > { %v3297_v63 = vpop.permute.xlu0 %874 }
 0x1a6   : > { %4404 = vst [vmem:[#allocation101_spill] sm:$0xff] %v3297_v63  ;;  %v4409_v63 = vld [vmem:[#allocation28_spill] sm:$0xff] }
 0x1aa   : > { %1032 = vrot.lane.b32.xlu2 %v4405_v41, %s2466_s19  ;;  %1030 = vrot.lane.b32.xlu1 %v4406_v57, %s2466_s19  ;;  %v1478_v41 = vsel %vm1458_vm0, %v4410_v18, %v4409_v63  ;;  %v4411_v57 = vld [vmem:[#allocation30_spill] sm:$0xff] }
 0x1ab   : > { %1028 = vrot.lane.b32.xlu0 %v4407_v36, %s2466_s19  ;;  %v1511_v36 = vsel %vm1491_vm1, %v1478_v41, %v3066_v35  ;;  %v3337_v35 = vld [vmem:[%s2499_s14 + $0x18a] sm:$0xff]  ;;  %v4414_v41 = vld [vmem:[#allocation34_spill] sm:$0xff] }
 0x1ac   : > { %v3305_v46 = vpop.permute.xlu2 %902  ;;  %v3307_v56 = vpop.permute.xlu1 %882  ;;  %v1544_v15 = vsel %vm1524_vm2, %v1511_v36, %v3146_v19  ;;  %4413 = vst [vmem:[#allocation26_spill] sm:$0xff] %v3337_v35 }
 0x1ad   : > { %v3309_v48 = vpop.permute.xlu0 %880 }
 0x1b2   : > { %1038 = vrot.lane.b32.xlu2 %v3312_v23, %s2466_s19  ;;  %1036 = vrot.lane.b32.xlu1 %v4411_v57, %s2466_s19  ;;  %v2284_v57 = vld [vmem:[%s2499_s14 + $0x38] sm:$0xff] }
 0x1b3   : > { %1034 = vrot.lane.b32.xlu0 %v4412_v42, %s2466_s19  ;;  %v1481_v42 = vsel %vm1458_vm0, %v4415_v12, %v4414_v41  ;;  %v4417_v41 = vld [vmem:[#allocation9_spill] sm:$0xff] }
 0x1b4   : > { %v3327_v38 = vpop.permute.xlu2 %908  ;;  %v889_v18 = vpop.permute.xlu1 %888  ;;  %v1514_v19 = vsel %vm1491_vm1, %v1481_v42, %v3078_v61  ;;  %v4419_v61 = vld [vmem:[#allocation38_spill] sm:$0xff] }
 0x1b5   : > { %v3330_v63 = vsel %vm1557_vm3, %v1544_v15, %v889_v18  ;;  %v3332_v23 = vpop.permute.xlu0 %886  ;;  %v1547_v15 = vsel %vm1524_vm2, %v1514_v19, %v3158_v22  ;;  %v4422_v19 = vld [vmem:[#allocation42_spill] sm:$0xff] }
 0x1ba   : > { %1108 = vrot.lane.b32.xlu2 %v2284_v57, %s2467_s20  ;;  %1106 = vrot.lane.b32.xlu1 %v2283_v51, %s2467_s20  ;;  %v2287_v57 = vld [vmem:[%s2499_s14 + $0x60] sm:$0xff]  ;;  %v4418_v51 = vld [vmem:[#allocation32_spill] sm:$0xff] }
 0x1bb   : > { %1040 = vrot.lane.b32.xlu0 %v3337_v35, %s2466_s19  ;;  %v1462_v5 = vsel %vm1458_vm0, %v4418_v51, %v4417_v41  ;;  %v4420_v35 = vld [vmem:[#allocation39_spill] sm:$0xff]  ;;  %v4425_v51 = vld [vmem:[#allocation36_spill] sm:$0xff] }
 0x1bc   : > { %v3350_v36 = vpop.permute.xlu2 %978  ;;  %v895_v18 = vpop.permute.xlu1 %894  ;;  %v1495_v42 = vsel %vm1491_vm1, %v1462_v5, %v4419_v61  ;;  %v1484_v22 = vsel %vm1458_vm0, %v4421_v10, %v4420_v35  ;;  %v4426_v10 = vld [vmem:[#allocation78_spill] sm:$0xff] }
 0x1bd   : > { %4416 = vst [vmem:[#allocation20_spill] sm:$0xff] %v3350_v36  ;;  %v3353_v17 = vsel %vm1557_vm3, %v1547_v15, %v895_v18  ;;  %v3355_v12 = vpop.permute.xlu0 %892  ;;  %v4423_v15 = vld [vmem:[#allocation40_spill] sm:$0xff]  ;;  %v4424_v18 = vld [vmem:[#allocation70_spill] sm:$0xff]  ;;  %v1517_v41 = vsel %vm1491_vm1, %v1484_v22, %v3090_v1  ;;  %v1528_v5 = vsel %vm1524_vm2, %v1495_v42, %v3124_v14 }
 0x1be   : > { %v1483_v36 = vsel %vm1458_vm0, %v4424_v18, %v4423_v15  ;;  %v1561_v61 = vsel %vm1557_vm3, %v1528_v5, %v3261_v45  ;;  %v4427_v45 = vld [vmem:[#allocation47_spill] sm:$0xff]  ;;  %v4429_v5 = vld [vmem:[#allocation76_spill] sm:$0xff] }
 0x1bf   : > { %v1516_v35 = vsel %vm1491_vm1, %v1483_v36, %v4426_v10 }
 0x1c0   : > { %v1549_v1 = vsel %vm1524_vm2, %v1516_v35, %v3211_v20 }
 0x1c2   : > { %1114 = vrot.lane.b32.xlu2 %v2287_v57, %s2467_s20  ;;  %1112 = vrot.lane.b32.xlu1 %v4422_v19, %s2467_s20  ;;  %v1550_v57 = vsel %vm1524_vm2, %v1517_v41, %v3170_v25  ;;  %v2290_v25 = vld [vmem:[%s2499_s14 + $0x80] sm:$0xff]  ;;  %v4428_v41 = vld [vmem:[#allocation45_spill] sm:$0xff] }
 0x1c3   : > { %1110 = vrot.lane.b32.xlu0 %v4425_v51, %s2467_s20  ;;  %v1486_v20 = vsel %vm1458_vm0, %v4429_v5, %v4428_v41  ;;  %v4430_v51 = vld [vmem:[#allocation41_spill] sm:$0xff]  ;;  %v4433_v41 = vld [vmem:[#allocation50_spill] sm:$0xff] }
 0x1c4   : > { %v985_v15 = vpop.permute.xlu2 %984  ;;  %v901_v18 = vpop.permute.xlu1 %900  ;;  %v1519_v10 = vsel %vm1491_vm1, %v1486_v20, %v3047_v60  ;;  %v4432_v60 = vld [vmem:[#allocation53_spill] sm:$0xff]  ;;  %v4434_v5 = vld [vmem:[#allocation82_spill] sm:$0xff] }
 0x1c5   : > { %v3387_v14 = vsel %vm1590_vm4, %v1561_v61, %v985_v15  ;;  %v3390_v42 = vsel %vm1557_vm3, %v1550_v57, %v901_v18  ;;  %v899_v36 = vpop.permute.xlu0 %898  ;;  %v1552_v61 = vsel %vm1524_vm2, %v1519_v10, %v3223_v39  ;;  %v1489_v20 = vsel %vm1458_vm0, %v4434_v5, %v4433_v41  ;;  %v2296_v41 = vld [vmem:[%s2499_s14 + $0xc8] sm:$0xff] }
 0x1c6   : > { %v3393_v22 = vsel %vm1557_vm3, %v1549_v1, %v899_v36  ;;  %v2293_v1 = vld [vmem:[%s2499_s14 + $0xa8] sm:$0xff]  ;;  %v4431_v36 = vld [vmem:[#allocation49_spill] sm:$0xff]  ;;  %v1522_v10 = vsel %vm1491_vm1, %v1489_v20, %v3062_v30  ;;  %v4437_v30 = vld [vmem:[#allocation6_spill] sm:$0xff] }
 0x1c7   : > { %v4438_v5 = vld [vmem:[#allocation31_spill] sm:$0xff] }
 0x1c8   : > { %v4439_v20 = vld [vmem:[#allocation55_spill] sm:$0xff] }
 0x1ca   : > { %1120 = vrot.lane.b32.xlu2 %v2290_v25, %s2467_s20  ;;  %1118 = vrot.lane.b32.xlu1 %v4427_v45, %s2467_s20  ;;  %v1490_v25 = vsel %vm1458_vm0, %v3056_v49, %v4431_v36 }
 0x1cb   : > { %1116 = vrot.lane.b32.xlu0 %v4430_v51, %s2467_s20  ;;  %v1523_v39 = vsel %vm1491_vm1, %v1490_v25, %v3114_v6  ;;  %v4435_v51 = vld [vmem:[#allocation46_spill] sm:$0xff] }
 0x1cc   : > { %v3406_v35 = vpop.permute.xlu2 %990  ;;  %v3408_v57 = vpop.permute.xlu1 %906  ;;  %v1556_v49 = vsel %vm1524_vm2, %v1523_v39, %v3197_v31  ;;  %v1461_v31 = vsel %vm1458_vm0, %v4438_v5, %v4437_v30  ;;  %v2331_v30 = vld [vmem:[%s2499_s14 + $0xf1] sm:$0xff] }
 0x1cd   : > { %v905_v15 = vpop.permute.xlu0 %904  ;;  %v1494_v39 = vsel %vm1491_vm1, %v1461_v31, %v4439_v20  ;;  %v2299_v5 = vld [vmem:[%s2499_s14 + $0xf0] sm:$0xff] }
 0x1ce   : > { %v3413_v18 = vsel %vm1557_vm3, %v1552_v61, %v905_v15  ;;  %v4444_v20 = vld [vmem:[#allocation60_spill] sm:$0xff] }
 0x1d2   : > { %1126 = vrot.lane.b32.xlu2 %v2293_v1, %s2467_s20  ;;  %1124 = vrot.lane.b32.xlu1 %v4432_v60, %s2467_s20  ;;  %v1555_v1 = vsel %vm1524_vm2, %v1522_v10, %v3235_v43  ;;  %v4440_v43 = vld [vmem:[#allocation59_spill] sm:$0xff]  ;;  %v4441_v10 = vld [vmem:[#allocation52_spill] sm:$0xff] }
 0x1d3   : > { %1122 = vrot.lane.b32.xlu0 %v4435_v51, %s2467_s20  ;;  %v1527_v51 = vsel %vm1524_vm2, %v1494_v39, %v3126_v9  ;;  %v4443_v9 = vld [vmem:[#allocation23_spill] sm:$0xff] }
 0x1d4   : > { %v3433_v61 = vpop.permute.xlu2 %996  ;;  %v913_v15 = vpop.permute.xlu1 %912  ;;  %v1474_v31 = vsel %vm1458_vm0, %v4441_v10, %v4443_v9 }
 0x1d5   : > { %4436 = vst [vmem:[#allocation28_spill] sm:$0xff] %v3433_v61  ;;  %v3438_v36 = vsel %vm1557_vm3, %v1556_v49, %v913_v15  ;;  %v911_v6 = vpop.permute.xlu0 %910  ;;  %v1560_v49 = vsel %vm1557_vm3, %v1527_v51, %v3209_v34  ;;  %v1507_v34 = vsel %vm1491_vm1, %v1474_v31, %v4444_v20  ;;  %v4445_v51 = vld [vmem:[#allocation58_spill] sm:$0xff]  ;;  %v2363_v31 = vld [vmem:[%s2499_s14 + $0xf2] sm:$0xff] }
 0x1d6   : > { %v3441_v25 = vsel %vm1557_vm3, %v1555_v1, %v911_v6  ;;  %v1540_v39 = vsel %vm1524_vm2, %v1507_v34, %v3172_v21  ;;  %v4447_v21 = vld [vmem:[#allocation29_spill] sm:$0xff]  ;;  %v4448_v34 = vld [vmem:[#allocation66_spill] sm:$0xff] }
 0x1d7   : > { %v1477_v20 = vsel %vm1458_vm0, %v4445_v51, %v4447_v21  ;;  %v2347_v21 = vld [vmem:[%s2499_s14 + $0x32] sm:$0xff] }
 0x1da   : > { %1132 = vrot.lane.b32.xlu2 %v2296_v41, %s2467_s20  ;;  %1130 = vrot.lane.b32.xlu1 %v4440_v43, %s2467_s20 }
 0x1db   : > { %1128 = vrot.lane.b32.xlu0 %v4441_v10, %s2467_s20 }
 0x1dc   : > { %v3458_v15 = vpop.permute.xlu2 %1002  ;;  %v983_v1 = vpop.permute.xlu1 %982 }
 0x1dd   : > { %4442 = vst [vmem:[#allocation65_spill] sm:$0xff] %v3458_v15  ;;  %v3461_v6 = vsel %vm1590_vm4, %v1560_v49, %v983_v1  ;;  %v3463_v41 = vpop.permute.xlu0 %980  ;;  %v1573_v49 = vsel %vm1557_vm3, %v1540_v39, %v3309_v48  ;;  %v1510_v48 = vsel %vm1491_vm1, %v1477_v20, %v4448_v34  ;;  %v4450_v20 = vld [vmem:[#allocation35_spill] sm:$0xff] }
 0x1de   : > { %v1543_v39 = vsel %vm1524_vm2, %v1510_v48, %v3184_v29  ;;  %v4451_v29 = vld [vmem:[#allocation64_spill] sm:$0xff]  ;;  %v4457_v15 = vld [vmem:[#allocation79_spill] sm:$0xff] }
 0x1df   : > { %v1480_v34 = vsel %vm1458_vm0, %v4451_v29, %v4450_v20 }
 0x1e2   : > { %1266 = vrot.lane.b32.xlu2 %v2331_v30, %s2468_s21  ;;  %1138 = vrot.lane.b32.xlu1 %v2299_v5, %s2467_s20  ;;  %v2323_v30 = vld [vmem:[%s2499_s14 + $0x91] sm:$0xff] }
 0x1e3   : > { %1134 = vrot.lane.b32.xlu0 %v4445_v51, %s2467_s20  ;;  %v2315_v5 = vld [vmem:[%s2499_s14 + $0x31] sm:$0xff] }
 0x1e4   : > { %v1009_v1 = vpop.permute.xlu2 %1008  ;;  %v3480_v61 = vpop.permute.xlu1 %988 }
 0x1e5   : > { %v3483_v10 = vsel %vm1590_vm4, %v1573_v49, %v1009_v1  ;;  %v3485_v9 = vpop.permute.xlu0 %986  ;;  %v1576_v49 = vsel %vm1557_vm3, %v1543_v39, %v3332_v23 }
 0x1e6   : > { %4446 = vst [vmem:[#allocation30_spill] sm:$0xff] %v3483_v10 }
 0x1ea   : > { %1250 = vrot.lane.b32.xlu2 %v2323_v30, %s2468_s21  ;;  %1234 = vrot.lane.b32.xlu1 %v2315_v5, %s2468_s21  ;;  %v2355_v5 = vld [vmem:[%s2499_s14 + $0x92] sm:$0xff] }
 0x1eb   : > { %1394 = vrot.lane.b32.xlu0 %v2363_v31, %s2469_s22  ;;  %v4452_v31 = vld [vmem:[#allocation72_spill] sm:$0xff] }
 0x1ec   : > { %v1015_v1 = vpop.permute.xlu2 %1014  ;;  %v3502_v10 = vpop.permute.xlu1 %994  ;;  %v1513_v48 = vsel %vm1491_vm1, %v1480_v34, %v4452_v31  ;;  %v2332_v31 = vld [vmem:[%s2499_s14 + $0xf9] sm:$0xff] }
 0x1ed   : > { %v3505_v51 = vsel %vm1590_vm4, %v1576_v49, %v1015_v1  ;;  %v3507_v30 = vpop.permute.xlu0 %992  ;;  %v1546_v23 = vsel %vm1524_vm2, %v1513_v48, %v3199_v27  ;;  %v4456_v48 = vld [vmem:[#allocation18_spill] sm:$0xff] }
 0x1ee   : > { %4449 = vst [vmem:[#allocation24_spill] sm:$0xff] %v3505_v51  ;;  %v1579_v39 = vsel %vm1557_vm3, %v1546_v23, %v3355_v12  ;;  %v4455_v51 = vld [vmem:[#allocation51_spill] sm:$0xff] }
 0x1ef   : > { %v4458_v23 = vld [vmem:[#allocation83_spill] sm:$0xff] }
 0x1f2   : > { %1378 = vrot.lane.b32.xlu2 %v2355_v5, %s2469_s22  ;;  %1362 = vrot.lane.b32.xlu1 %v2347_v21, %s2469_s22  ;;  %v2364_v5 = vld [vmem:[%s2499_s14 + $0xfa] sm:$0xff]  ;;  %v4454_v21 = vld [vmem:[#allocation8_spill] sm:$0xff] }
 0x1f3   : > { %1140 = vrot.lane.b32.xlu0 %v4451_v29, %s2467_s20  ;;  %v1473_v27 = vsel %vm1458_vm0, %v4455_v51, %v4454_v21  ;;  %v1472_v29 = vsel %vm1458_vm0, %v4432_v60, %v4456_v48 }
 0x1f4   : > { %v1021_v49 = vpop.permute.xlu2 %1020  ;;  %v3524_v1 = vpop.permute.xlu1 %1000  ;;  %v1506_v12 = vsel %vm1491_vm1, %v1473_v27, %v4457_v15 }
 0x1f5   : > { %v3527_v20 = vsel %vm1590_vm4, %v1579_v39, %v1021_v49  ;;  %v3529_v34 = vpop.permute.xlu0 %998  ;;  %v4459_v39 = vld [vmem:[#allocation80_spill] sm:$0xff]  ;;  %v1539_v51 = vsel %vm1524_vm2, %v1506_v12, %v3174_v26  ;;  %v2324_v12 = vld [vmem:[%s2499_s14 + $0x99] sm:$0xff] }
 0x1f6   : > { %4453 = vst [vmem:[#allocation34_spill] sm:$0xff] %v3527_v20  ;;  %v1505_v49 = vsel %vm1491_vm1, %v1472_v29, %v4459_v39  ;;  %v1572_v15 = vsel %vm1557_vm3, %v1539_v51, %v3257_v52  ;;  %v2316_v39 = vld [vmem:[%s2499_s14 + $0x39] sm:$0xff]  ;;  %v4460_v52 = vld [vmem:[#allocation11_spill] sm:$0xff] }
 0x1f7   : > { %v1538_v60 = vsel %vm1524_vm2, %v1505_v49, %v3122_v13  ;;  %v2339_v13 = vld [vmem:[%s2499_s14 + $0x151] sm:$0xff]  ;;  %v4462_v20 = vld [vmem:[#allocation22_spill] sm:$0xff] }
 0x1f8   : > { %v1571_v48 = vsel %vm1557_vm3, %v1538_v60, %v3295_v44  ;;  %v4461_v49 = vld [vmem:[#allocation57_spill] sm:$0xff]  ;;  %v1475_v44 = vsel %vm1458_vm0, %v4440_v43, %v4462_v20  ;;  %v4463_v60 = vld [vmem:[#allocation84_spill] sm:$0xff] }
 0x1f9   : > { %v1476_v51 = vsel %vm1458_vm0, %v4461_v49, %v4460_v52  ;;  %v4464_v52 = vld [vmem:[#allocation14_spill] sm:$0xff]  ;;  %v4465_v49 = vld [vmem:[#allocation63_spill] sm:$0xff] }
 0x1fa   : > { %1154 = vrot.lane.b32.xlu2 %v4458_v23, %s2467_s20  ;;  %1396 = vrot.lane.b32.xlu1 %v2364_v5, %s2469_s22 }
 0x1fb   : > { %1268 = vrot.lane.b32.xlu0 %v2332_v31, %s2468_s21 }
 0x1fc   : > { %v1027_v21 = vpop.permute.xlu2 %1026  ;;  %v1007_v27 = vpop.permute.xlu1 %1006 }
 0x1fd   : > { %v3557_v5 = vsel %vm1590_vm4, %v3393_v22, %v1027_v21  ;;  %v3560_v29 = vsel %vm1590_vm4, %v1572_v15, %v1007_v27  ;;  %v1005_v26 = vpop.permute.xlu0 %1004  ;;  %v1509_v22 = vsel %vm1491_vm1, %v1476_v51, %v3049_v54  ;;  %v1508_v15 = vsel %vm1491_vm1, %v1475_v44, %v4463_v60 }
 0x1fe   : > { %v3563_v31 = vsel %vm1590_vm4, %v1571_v48, %v1005_v26  ;;  %v1542_v21 = vsel %vm1524_vm2, %v1509_v22, %v3186_v24  ;;  %v1541_v43 = vsel %vm1524_vm2, %v1508_v15, %v3134_v16  ;;  %v2356_v16 = vld [vmem:[%s2499_s14 + $0x9a] sm:$0xff]  ;;  %v145_v15 = vld [vmem:[%s2499_s14 + $0x8] sm:$0xff] }
 0x1ff   : > { %v1575_v54 = vsel %vm1557_vm3, %v1542_v21, %v3269_v58  ;;  %v1574_v48 = vsel %vm1557_vm3, %v1541_v43, %v3307_v56  ;;  %v2301_v58 = vld [vmem:[%s2499_s14 + $0x108] sm:$0xff]  ;;  %v1479_v56 = vsel %vm1458_vm0, %v4465_v49, %v4464_v52 }
 0x202   : > { %1282 = vrot.lane.b32.xlu2 %v2339_v13, %s2468_s21  ;;  %1252 = vrot.lane.b32.xlu1 %v2324_v12, %s2468_s21 }
 0x203   : > { %1236 = vrot.lane.b32.xlu0 %v2316_v39, %s2468_s21  ;;  %v2348_v39 = vld [vmem:[%s2499_s14 + $0x3a] sm:$0xff] }
 0x204   : > { %v1033_v20 = vpop.permute.xlu2 %1032  ;;  %v1013_v27 = vpop.permute.xlu1 %1012 }
 0x205   : > { %v3591_v26 = vsel %vm1590_vm4, %v3413_v18, %v1033_v20  ;;  %v3594_v24 = vsel %vm1590_vm4, %v1575_v54, %v1013_v27  ;;  %v1011_v13 = vpop.permute.xlu0 %1010  ;;  %v1512_v18 = vsel %vm1491_vm1, %v1479_v56, %v3064_v62  ;;  %v2333_v20 = vld [vmem:[%s2499_s14 + $0x109] sm:$0xff]  ;;  %v4466_v27 = vld [vmem:[#allocation10_spill] sm:$0xff] }
 0x206   : > { %v3597_v12 = vsel %vm1590_vm4, %v1574_v48, %v1011_v13  ;;  %v1545_v51 = vsel %vm1524_vm2, %v1512_v18, %v3201_v32  ;;  %v2365_v32 = vld [vmem:[%s2499_s14 + $0x10a] sm:$0xff]  ;;  %v2371_v48 = vld [vmem:[%s2499_s14 + $0x152] sm:$0xff] }
 0x207   : > { %v1578_v44 = vsel %vm1557_vm3, %v1545_v51, %v3281_v2  ;;  %v1460_v2 = vsel %vm1458_vm0, %v145_v15, %v4466_v27  ;;  %v4467_v13 = vld [vmem:[#allocation17_spill] sm:$0xff]  ;;  %v2317_v15 = vld [vmem:[%s2499_s14 + $0x49] sm:$0xff] }
 0x208   : > { %v4473_v27 = vld [vmem:[#allocation75_spill] sm:$0xff] }
 0x20a   : > { %1380 = vrot.lane.b32.xlu2 %v2356_v16, %s2469_s22  ;;  %1364 = vrot.lane.b32.xlu1 %v2348_v39, %s2469_s22  ;;  %v4468_v16 = vld [vmem:[#allocation69_spill] sm:$0xff] }
 0x20b   : > { %1142 = vrot.lane.b32.xlu0 %v2301_v58, %s2467_s20  ;;  %v1482_v39 = vsel %vm1458_vm0, %v4468_v16, %v4467_v13 }
 0x20c   : > { %v1039_v22 = vpop.permute.xlu2 %1038  ;;  %v1019_v60 = vpop.permute.xlu1 %1018 }
 0x20d   : > { %v3617_v21 = vsel %vm1590_vm4, %v3441_v25, %v1039_v22  ;;  %v3620_v62 = vsel %vm1590_vm4, %v1578_v44, %v1019_v60  ;;  %v1017_v43 = vpop.permute.xlu0 %1016  ;;  %v4469_v25 = vld [vmem:[#allocation56_spill] sm:$0xff] }
 0x20e   : > { %v3624_v54 = vsel %vm1590_vm4, %v3330_v63, %v1017_v43  ;;  %v1493_v58 = vsel %vm1491_vm1, %v1460_v2, %v4469_v25  ;;  %v1515_v63 = vsel %vm1491_vm1, %v1482_v39, %v3076_v55  ;;  %v2325_v60 = vld [vmem:[%s2499_s14 + $0xa9] sm:$0xff]  ;;  %v4470_v43 = vld [vmem:[#allocation2_spill] sm:$0xff] }
 0x20f   : > { %v1526_v52 = vsel %vm1524_vm2, %v1493_v58, %v3074_v50  ;;  %v1548_v49 = vsel %vm1524_vm2, %v1515_v63, %v3213_v11 }
 0x210   : > { %v1559_v56 = vsel %vm1557_vm3, %v1526_v52, %v3247_v47  ;;  %v1581_v50 = vsel %vm1557_vm3, %v1548_v49, %v3293_v40  ;;  %v4471_v40 = vld [vmem:[#allocation37_spill] sm:$0xff] }
 0x211   : > { %v1592_v55 = vsel %vm1590_vm4, %v1559_v56, %v3463_v41  ;;  %v2308_v41 = vld [vmem:[%s2499_s14 + $0x158] sm:$0xff]  ;;  %v2349_v56 = vld [vmem:[%s2499_s14 + $0x4a] sm:$0xff] }
 0x212   : > { %1398 = vrot.lane.b32.xlu2 %v2365_v32, %s2469_s22  ;;  %1270 = vrot.lane.b32.xlu1 %v2333_v20, %s2468_s21  ;;  %v1463_v32 = vsel %vm1458_vm0, %v4471_v40, %v4470_v43  ;;  %v4472_v20 = vld [vmem:[#allocation21_spill] sm:$0xff]  ;;  %v4479_v43 = vld [vmem:[#allocation44_spill] sm:$0xff] }
 0x213   : > { %1410 = vrot.lane.b32.xlu0 %v2371_v48, %s2469_s22  ;;  %v1485_v2 = vsel %vm1458_vm0, %v4473_v27, %v4472_v20  ;;  %v4474_v48 = vld [vmem:[#allocation62_spill] sm:$0xff]  ;;  %v1487_v40 = vsel %vm1458_vm0, %v4458_v23, %v4479_v43 }
 0x214   : > { %v1109_v18 = vpop.permute.xlu2 %1108  ;;  %v1025_v51 = vpop.permute.xlu1 %1024  ;;  %v1496_v13 = vsel %vm1491_vm1, %v1463_v32, %v4474_v48  ;;  %v2334_v48 = vld [vmem:[%s2499_s14 + $0x111] sm:$0xff] }
 0x215   : > { %v3652_v44 = vsel %vm1623_vm5, %v1592_v55, %v1109_v18  ;;  %v3655_v22 = vsel %vm1590_vm4, %v1581_v50, %v1025_v51  ;;  %v1023_v11 = vpop.permute.xlu0 %1022  ;;  %v1529_v16 = vsel %vm1524_vm2, %v1496_v13, %v3086_v0  ;;  %v2302_v50 = vld [vmem:[%s2499_s14 + $0x110] sm:$0xff]  ;;  %v4476_v18 = vld [vmem:[#allocation27_spill] sm:$0xff]  ;;  %v4477_v51 = vld [vmem:[#allocation81_spill] sm:$0xff] }
 0x216   : > { %v3659_v47 = vsel %vm1590_vm4, %v3353_v17, %v1023_v11  ;;  %v1518_v17 = vsel %vm1491_vm1, %v1485_v2, %v3088_v4  ;;  %v1562_v25 = vsel %vm1557_vm3, %v1529_v16, %v3259_v53  ;;  %v4475_v55 = vld [vmem:[#allocation12_spill] sm:$0xff]  ;;  %v1488_v11 = vsel %vm1458_vm0, %v4477_v51, %v4476_v18  ;;  %v2372_v13 = vld [vmem:[%s2499_s14 + $0x15a] sm:$0xff]  ;;  %v4480_v16 = vld [vmem:[#allocation15_spill] sm:$0xff] }
 0x217   : > { %v1551_v39 = vsel %vm1524_vm2, %v1518_v17, %v3225_v33  ;;  %v1595_v58 = vsel %vm1590_vm4, %v1562_v25, %v3485_v9  ;;  %v2340_v9 = vld [vmem:[%s2499_s14 + $0x159] sm:$0xff]  ;;  %v1521_v32 = vsel %vm1491_vm1, %v1488_v11, %v3100_v8  ;;  %v1469_v17 = vsel %vm1458_vm0, %v4427_v45, %v4480_v16  ;;  %v1724_v25 = vld [vmem:[%s4261_s1 + $0x10] sm:$0xff]  ;;  %v4483_v45 = vld [vmem:[#allocation99_spill] sm:$0xff] }
 0x218   : > { %v1584_v0 = vsel %vm1557_vm3, %v1551_v39, %v3305_v46  ;;  %v1466_v46 = vsel %vm1458_vm0, %v4422_v19, %v4475_v55  ;;  %v1520_v19 = vsel %vm1491_vm1, %v1487_v40, %v3102_v3  ;;  %v2357_v39 = vld [vmem:[%s2499_s14 + $0xaa] sm:$0xff]  ;;  %v1722_v51 = vld [vmem:[%s4261_s1] sm:$0xff] }
 0x21a   : > { %1254 = vrot.lane.b32.xlu2 %v2325_v60, %s2468_s21  ;;  %1238 = vrot.lane.b32.xlu1 %v2317_v15, %s2468_s21  ;;  %v4478_v60 = vld [vmem:[#allocation68_spill] sm:$0xff] }
 0x21b   : > { %1156 = vrot.lane.b32.xlu0 %v2308_v41, %s2467_s20  ;;  %v1499_v15 = vsel %vm1491_vm1, %v1466_v46, %v4478_v60  ;;  %v1554_v41 = vsel %vm1524_vm2, %v1521_v32, %v3237_v37  ;;  %v2309_v60 = vld [vmem:[%s2499_s14 + $0x168] sm:$0xff] }
 0x21c   : > { %v1115_v4 = vpop.permute.xlu2 %1114  ;;  %v1031_v52 = vpop.permute.xlu1 %1030  ;;  %v1587_v8 = vsel %vm1557_vm3, %v1554_v41, %v3327_v38  ;;  %v1726_v38 = vld [vmem:[%s4261_s1 + $0x20] sm:$0xf] }
 0x21d   : > { %v3688_v63 = vsel %vm1623_vm5, %v1595_v58, %v1115_v4  ;;  %v3691_v49 = vsel %vm1590_vm4, %v1584_v0, %v1031_v52  ;;  %v1029_v33 = vpop.permute.xlu0 %1028  ;;  %2414 = vmatpush.msk.msra.mxu1 %vm1824_vm6, %v1726_v38  ;;  %2415 = vmatpush.msk.msra.mxu2 %vm1824_vm6, %v1726_v38  ;;  %v4481_v0 = vld [vmem:[#allocation74_spill] sm:$0xff]  ;;  %v4482_v4 = vld [vmem:[#allocation85_spill] sm:$0xff] }
 0x21e   : > { %v3695_v53 = vsel %vm1590_vm4, %v3390_v42, %v1029_v33  ;;  %v1532_v42 = vsel %vm1524_vm2, %v1499_v15, %v3098_v7  ;;  %v1553_v7 = vsel %vm1524_vm2, %v1520_v19, %v3182_v28  ;;  %2379 = vmatpush.msk.msra.mxu0 %vm1824_vm6, %v1726_v38  ;;  %2416 = vmatpush.msk.msra.mxu3 %vm1824_vm6, %v1726_v38  ;;  %v2366_v15 = vld [vmem:[%s2499_s14 + $0x112] sm:$0xff]  ;;  %v2303_v41 = vld [vmem:[%s2499_s14 + $0x120] sm:$0xff] }
 0x21f   : > { %v1565_v20 = vsel %vm1557_vm3, %v1532_v42, %v3271_v59  ;;  %v1586_v37 = vsel %vm1557_vm3, %v1553_v7, %v3408_v57  ;;  %v1725_v57 = vld [vmem:[%s4261_s1 + $0x18] sm:$0xff]  ;;  %v1502_v58 = vsel %vm1491_vm1, %v1469_v17, %v4481_v0  ;;  %v2447_v7 = vld [vmem:[%s2499_s14 + $0x48] sm:$0xff]  ;;  %v4490_v17 = vld [vmem:[#allocation98_spill] sm:$0xff] }
 0x220   : > { %v1598_v23 = vsel %vm1590_vm4, %v1565_v20, %v3507_v30  ;;  %2417 = vmatpush.msra.mxu1 %v1725_v57  ;;  %2418 = vmatpush.msra.mxu2 %v1725_v57  ;;  %v1535_v52 = vsel %vm1524_vm2, %v1502_v58, %v4482_v4  ;;  %v2341_v20 = vld [vmem:[%s2499_s14 + $0x169] sm:$0xff]  ;;  %v4487_v38 = vld [vmem:[#allocation61_spill] sm:$0xff] }
 0x221   : > { %1840 = vmatpush.msra.mxu0 %v1725_v57  ;;  %2419 = vmatpush.msra.mxu3 %v1725_v57  ;;  %v1568_v33 = vsel %vm1557_vm3, %v1535_v52, %v4483_v45 }
 0x222   : > { %1366 = vrot.lane.b32.xlu2 %v2349_v56, %s2469_s22  ;;  %1144 = vrot.lane.b32.xlu1 %v2302_v50, %s2467_s20  ;;  %v1723_v56 = vld [vmem:[%s4261_s1 + $0x8] sm:$0xff]  ;;  %v1601_v50 = vsel %vm1590_vm4, %v1568_v33, %v3529_v34  ;;  %v2318_v34 = vld [vmem:[%s2499_s14 + $0x51] sm:$0xff] }
 0x223   : > { %1284 = vrot.lane.b32.xlu0 %v2340_v9, %s2468_s21  ;;  %2420 = vmatpush.msra.mxu1 %v1724_v25 }
 0x224   : > { %v1121_v3 = vpop.permute.xlu2 %1120  ;;  %v1037_v27 = vpop.permute.xlu1 %1036  ;;  %2421 = vmatpush.msra.mxu2 %v1724_v25  ;;  %1841 = vmatpush.msra.mxu0 %v1724_v25 }
 0x225   : > { %v3733_v59 = vsel %vm1623_vm5, %v1598_v23, %v1121_v3  ;;  %v3736_v2 = vsel %vm1590_vm4, %v1587_v8, %v1037_v27  ;;  %v1035_v28 = vpop.permute.xlu0 %1034  ;;  %2423 = vmatpush.msra.mxu1 %v1723_v56  ;;  %2422 = vmatpush.msra.mxu3 %v1724_v25  ;;  %v4484_v8 = vld [vmem:[#allocation13_spill] sm:$0xff]  ;;  %v4491_v25 = vld [vmem:[#allocation94_spill] sm:$0xff] }
 0x226   : > { %v3742_v30 = vsel %vm1590_vm4, %v1586_v37, %v1035_v28  ;;  %2424 = vmatpush.msra.mxu2 %v1723_v56  ;;  %1842 = vmatpush.msra.mxu0 %v1723_v56  ;;  %v1465_v23 = vsel %vm1458_vm0, %v2447_v7, %v4484_v8  ;;  %v2326_v3 = vld [vmem:[%s2499_s14 + $0xb1] sm:$0xff]  ;;  %v4485_v37 = vld [vmem:[#allocation3_spill] sm:$0xff] }
 0x227   : > { %2426 = vmatpush.msra.mxu1 %v1722_v51  ;;  %2425 = vmatpush.msra.mxu3 %v1723_v56  ;;  %v2448_v27 = vld [vmem:[%s2499_s14 + $0x38] sm:$0xff]  ;;  %v4486_v28 = vld [vmem:[#allocation43_spill] sm:$0xff] }
 0x228   : > { %2427 = vmatpush.msra.mxu2 %v1722_v51  ;;  %1843 = vmatpush.msra.mxu0 %v1722_v51  ;;  %v4495_v7 = vld [vmem:[#allocation95_spill] sm:$0xff] }
 0x229   : > { %2428 = vmatpush.msra.mxu3 %v1722_v51  ;;  %v2350_v51 = vld [vmem:[%s2499_s14 + $0x52] sm:$0xff] }
 0x22a   : > { %1272 = vrot.lane.b32.xlu2 %v2334_v48, %s2468_s21  ;;  %1412 = vrot.lane.b32.xlu1 %v2372_v13, %s2469_s22  ;;  %v4489_v13 = vld [vmem:[#allocation88_spill] sm:$0xff] }
 0x22b   : > { %1382 = vrot.lane.b32.xlu0 %v2357_v39, %s2469_s22 }
 0x22c   : > { %v1127_v55 = vpop.permute.xlu2 %1126  ;;  %v3770_v46 = vpop.permute.xlu1 %1106 }
 0x22d   : > { %v3773_v9 = vsel %vm1623_vm5, %v1601_v50, %v1127_v55  ;;  %v1041_v18 = vpop.permute.xlu0 %1040  ;;  %v2373_v55 = vld [vmem:[%s2499_s14 + $0x16a] sm:$0xff] }
 0x22e   : > { %v3780_v11 = vsel %vm1590_vm4, %v3438_v36, %v1041_v18  ;;  %v2358_v18 = vld [vmem:[%s2499_s14 + $0xb2] sm:$0xff] }
 0x232   : > { %1240 = vrot.lane.b32.xlu2 %v2318_v34, %s2468_s21  ;;  %1158 = vrot.lane.b32.xlu1 %v2309_v60, %s2467_s20 }
 0x233   : > { %1400 = vrot.lane.b32.xlu0 %v2366_v15, %s2469_s22 }
 0x234   : > { %v1133_v36 = vpop.permute.xlu2 %1132  ;;  %v1113_v43 = vpop.permute.xlu1 %1112 }
 0x235   : > { %v3790_v40 = vsel %vm1623_vm5, %v3563_v31, %v1133_v36  ;;  %v3794_v42 = vsel %vm1623_vm5, %v3387_v14, %v1113_v43  ;;  %v1111_v32 = vpop.permute.xlu0 %1110  ;;  %v1464_v31 = vsel %vm1458_vm0, %v2448_v27, %v4485_v37  ;;  %v1498_v14 = vsel %vm1491_vm1, %v1465_v23, %v4486_v28  ;;  %v4493_v36 = vld [vmem:[#allocation67_spill] sm:$0xff]  ;;  %v2310_v23 = vld [vmem:[%s2499_s14 + $0x170] sm:$0xff] }
 0x236   : > { %v3798_v19 = vsel %vm1623_vm5, %v3461_v6, %v1111_v32  ;;  %v1497_v57 = vsel %vm1491_vm1, %v1464_v31, %v4487_v38  ;;  %v4488_v6 = vld [vmem:[#allocation87_spill] sm:$0xff]  ;;  %v2450_v27 = vld [vmem:[%s2499_s14 + $0x90] sm:$0xff]  ;;  %v2451_v38 = vld [vmem:[%s2499_s14 + $0x80] sm:$0xff] }
 0x237   : > { %v1531_v48 = vsel %vm1524_vm2, %v1498_v14, %v4488_v6  ;;  %v1530_v16 = vsel %vm1524_vm2, %v1497_v57, %v4489_v13  ;;  %v4496_v37 = vld [vmem:[#allocation19_spill] sm:$0xff]  ;;  %v4497_v57 = vld [vmem:[#allocation5_spill] sm:$0xff] }
 0x238   : > { %v1564_v39 = vsel %vm1557_vm3, %v1531_v48, %v4490_v17  ;;  %v1563_v0 = vsel %vm1557_vm3, %v1530_v16, %v4491_v25  ;;  %v1471_v31 = vsel %vm1458_vm0, %v2450_v27, %v4496_v37  ;;  %v2335_v14 = vld [vmem:[%s2499_s14 + $0x121] sm:$0xff]  ;;  %v1470_v6 = vsel %vm1458_vm0, %v2451_v38, %v4497_v57  ;;  %v4499_v17 = vld [vmem:[#allocation73_spill] sm:$0xff] }
 0x239   : > { %v1597_v58 = vsel %vm1590_vm4, %v1564_v39, %v3406_v35  ;;  %v1596_v45 = vsel %vm1590_vm4, %v1563_v0, %v3480_v61  ;;  %v2449_v35 = vld [vmem:[%s2499_s14 + $0x60] sm:$0xff]  ;;  %v4492_v61 = vld [vmem:[#allocation4_spill] sm:$0xff]  ;;  %v1503_v39 = vsel %vm1491_vm1, %v1470_v6, %v4499_v17  ;;  %v4500_v25 = vld [vmem:[#allocation91_spill] sm:$0xff] }
 0x23a   : > { %1146 = vrot.lane.b32.xlu2 %v2303_v41, %s2467_s20  ;;  %1286 = vrot.lane.b32.xlu1 %v2341_v20, %s2468_s21  ;;  %v1467_v34 = vsel %vm1458_vm0, %v2449_v35, %v4492_v61  ;;  %v4494_v41 = vld [vmem:[#allocation90_spill] sm:$0xff]  ;;  %v4506_v17 = vld [vmem:[#allocation33_spill] sm:$0xff] }
 0x23b   : > { %1256 = vrot.lane.b32.xlu0 %v2326_v3, %s2468_s21  ;;  %v1500_v43 = vsel %vm1491_vm1, %v1467_v34, %v4493_v36  ;;  %v2367_v3 = vld [vmem:[%s2499_s14 + $0x122] sm:$0xff] }
 0x23c   : > { %v3826_v4 = vpop.permute.xlu2 %1266  ;;  %v1119_v52 = vpop.permute.xlu1 %1118  ;;  %v1533_v20 = vsel %vm1524_vm2, %v1500_v43, %v4494_v41  ;;  %v4498_v48 = vld [vmem:[#allocation54_spill] sm:$0xff] }
 0x23d   : > { %v3831_v33 = vsel %vm1623_vm5, %v1597_v58, %v1119_v52  ;;  %v1117_v56 = vpop.permute.xlu0 %1116  ;;  %v1566_v8 = vsel %vm1557_vm3, %v1533_v20, %v4495_v7  ;;  %v1504_v13 = vsel %vm1491_vm1, %v1471_v31, %v4498_v48  ;;  %v4502_v52 = vld [vmem:[#allocation101_spill] sm:$0xff]  ;;  %v2359_v37 = vld [vmem:[%s2499_s14 + $0xc2] sm:$0xff] }
 0x23e   : > { %v3834_v50 = vsel %vm1623_vm5, %v1596_v45, %v1117_v56  ;;  %v1599_v28 = vsel %vm1590_vm4, %v1566_v8, %v3502_v10  ;;  %v1537_v0 = vsel %vm1524_vm2, %v1504_v13, %v4500_v25  ;;  %v4501_v10 = vld [vmem:[#allocation92_spill] sm:$0xff]  ;;  %v2319_v8 = vld [vmem:[%s2499_s14 + $0x61] sm:$0xff] }
 0x23f   : > { %v1536_v58 = vsel %vm1524_vm2, %v1503_v39, %v4501_v10  ;;  %v1570_v45 = vsel %vm1557_vm3, %v1537_v0, %v4502_v52  ;;  %v4503_v56 = vld [vmem:[#allocation96_spill] sm:$0xff]  ;;  %v2351_v31 = vld [vmem:[%s2499_s14 + $0x62] sm:$0xff] }
 0x240   : > { %v2342_v7 = vld [vmem:[%s2499_s14 + $0x171] sm:$0xff]  ;;  %v144_v38 = vld [vmem:[%s2499_s14] sm:$0xff]  ;;  %v4505_v13 = vld [vmem:[#allocation7_spill] sm:$0xff] }
 0x241   : > { %v2368_v25 = vld [vmem:[%s2499_s14 + $0x12a] sm:$0xff]  ;;  %v4507_v10 = vld [vmem:[#allocation86_spill] sm:$0xff]  ;;  %v2374_v52 = vld [vmem:[%s2499_s14 + $0x172] sm:$0xff] }
 0x242   : > { %1414 = vrot.lane.b32.xlu2 %v2373_v55, %s2469_s22  ;;  %1384 = vrot.lane.b32.xlu1 %v2358_v18, %s2469_s22  ;;  %v1569_v55 = vsel %vm1557_vm3, %v1536_v58, %v4503_v56  ;;  %v4504_v18 = vld [vmem:[#allocation65_spill] sm:$0xff]  ;;  %v2336_v0 = vld [vmem:[%s2499_s14 + $0x129] sm:$0xff] }
 0x243   : > { %1368 = vrot.lane.b32.xlu0 %v2350_v51, %s2469_s22  ;;  %v1603_v51 = vsel %vm1590_vm4, %v1570_v45, %v4504_v18  ;;  %v1602_v36 = vsel %vm1590_vm4, %v1569_v55, %v3524_v1  ;;  %v4509_v56 = vld [vmem:[#allocation20_spill] sm:$0xff] }
 0x244   : > { %v1251_v60 = vpop.permute.xlu2 %1250  ;;  %v3845_v15 = vpop.permute.xlu1 %1124 }
 0x245   : > { %v1123_v32 = vpop.permute.xlu0 %1122 }
 0x246   : > { %v1632_v16 = vsel %vm1623_vm5, %v1599_v28, %v1123_v32  ;;  %v2304_v28 = vld [vmem:[%s2499_s14 + $0x128] sm:$0xff] }
 0x247   : > { %v1665_v34 = vsel %vm1656_vm7, %v1632_v16, %v1251_v60  ;;  %v2327_v60 = vld [vmem:[%s2499_s14 + $0xc1] sm:$0xff]  ;;  %v1459_v16 = vsel %vm1458_vm0, %v144_v38, %v4505_v13  ;;  %v2352_v38 = vld [vmem:[%s2499_s14 + $0x6a] sm:$0xff]  ;;  %v4512_v13 = vld [vmem:[#allocation89_spill] sm:$0xff] }
 0x248   : > { %v1492_v39 = vsel %vm1491_vm1, %v1459_v16, %v4506_v17  ;;  %v4513_v16 = vld [vmem:[#allocation100_spill] sm:$0xff] }
 0x249   : > { %v1525_v58 = vsel %vm1524_vm2, %v1492_v39, %v4507_v10  ;;  %v4514_v17 = vld [vmem:[#allocation28_spill] sm:$0xff] }
 0x24a   : > { %1160 = vrot.lane.b32.xlu2 %v2310_v23, %s2467_s20  ;;  %1402 = vrot.lane.b32.xlu1 %v2367_v3, %s2469_s22 }
 0x24b   : > { %1274 = vrot.lane.b32.xlu0 %v2335_v14, %s2468_s21 }
 0x24c   : > { %v1379_v35 = vpop.permute.xlu2 %1378  ;;  %v1131_v61 = vpop.permute.xlu1 %1130 }
 0x24d   : > { %v3886_v43 = vsel %vm1623_vm5, %v1603_v51, %v1131_v61  ;;  %v1129_v32 = vpop.permute.xlu0 %1128  ;;  %v1698_v41 = vsel %vm1689_vm8, %v1665_v34, %v1379_v35 }
 0x24e   : > { %v3890_v20 = vsel %vm1623_vm5, %v1602_v36, %v1129_v32  ;;  %2388 = vmatmul.msk.f32.vlgmr.msra.gmra.mxu1 %vm1727_vm9, %v1698_v41  ;;  %v2328_v32 = vld [vmem:[%s2499_s14 + $0xc9] sm:$0xff] }
 0x24f   : > { %v2320_v41 = vld [vmem:[%s2499_s14 + $0x69] sm:$0xff] }
 0x252   : > { %1288 = vrot.lane.b32.xlu2 %v2342_v7, %s2468_s21  ;;  %1258 = vrot.lane.b32.xlu1 %v2327_v60, %s2468_s21  ;;  %v2311_v7 = vld [vmem:[%s2499_s14 + $0x180] sm:$0xff] }
 0x253   : > { %1242 = vrot.lane.b32.xlu0 %v2319_v8, %s2468_s21 }
 0x254   : > { %v3899_v1 = vpop.permute.xlu2 %1154  ;;  %v1139_v23 = vpop.permute.xlu1 %1138 }
 0x255   : > { %v1135_v3 = vpop.permute.xlu0 %1134  ;;  %v1640_v14 = vsel %vm1623_vm5, %v3597_v12, %v1139_v23 }
 0x256   : > { %v3903_v27 = vsel %vm1623_vm5, %v3560_v29, %v1135_v3  ;;  %v1673_v48 = vsel %vm1656_vm7, %v1640_v14, %v3826_v4  ;;  %v4508_v4 = vld [vmem:[#allocation97_spill] sm:$0xff] }
 0x257   : > { %v1558_v45 = vsel %vm1557_vm3, %v1525_v58, %v4508_v4 }
 0x258   : > { %v1591_v55 = vsel %vm1590_vm4, %v1558_v45, %v4509_v56  ;;  %v2337_v56 = vld [vmem:[%s2499_s14 + $0x139] sm:$0xff] }
 0x259   : > { %v1624_v18 = vsel %vm1623_vm5, %v1591_v55, %v3770_v46  ;;  %v2360_v55 = vld [vmem:[%s2499_s14 + $0xca] sm:$0xff] }
 0x25a   : > { %1386 = vrot.lane.b32.xlu2 %v2359_v37, %s2469_s22  ;;  %1370 = vrot.lane.b32.xlu1 %v2351_v31, %s2469_s22  ;;  %v2452_v37 = vld [vmem:[%s2499_s14 + $0x68] sm:$0xff]  ;;  %v4510_v31 = vld [vmem:[#allocation16_spill] sm:$0xff] }
 0x25b   : > { %1148 = vrot.lane.b32.xlu0 %v2304_v28, %s2467_s20  ;;  %v1468_v28 = vsel %vm1458_vm0, %v2452_v37, %v4510_v31 }
 0x25c   : > { %v3914_v57 = vpop.permute.xlu2 %1282  ;;  %v1235_v29 = vpop.permute.xlu1 %1234 }
 0x25d   : > { %v1395_v6 = vpop.permute.xlu0 %1394  ;;  %v1657_v51 = vsel %vm1656_vm7, %v1624_v18, %v1235_v29  ;;  %v2305_v29 = vld [vmem:[%s2499_s14 + $0x138] sm:$0xff] }
 0x25e   : > { %v1706_v12 = vsel %vm1689_vm8, %v1673_v48, %v1395_v6  ;;  %v4511_v6 = vld [vmem:[#allocation48_spill] sm:$0xff]  ;;  %v4516_v18 = vld [vmem:[#allocation25_spill] sm:$0xff] }
 0x25f   : > { %2396 = vmatmul.msk.f32.vlgmr.msra.gmra.mxu2 %vm1727_vm9, %v1706_v12  ;;  %v1501_v48 = vsel %vm1491_vm1, %v1468_v28, %v4511_v6 }
 0x262   : > { %1404 = vrot.lane.b32.xlu2 %v2368_v25, %s2469_s22  ;;  %1276 = vrot.lane.b32.xlu1 %v2336_v0, %s2468_s21  ;;  %v4515_v25 = vld [vmem:[#allocation93_spill] sm:$0xff] }
 0x263   : > { %1416 = vrot.lane.b32.xlu0 %v2374_v52, %s2469_s22 }
 0x264   : > { %v1381_v35 = vpop.permute.xlu2 %1380  ;;  %v1363_v61 = vpop.permute.xlu1 %1362 }
 0x265   : > { %v1141_v34 = vpop.permute.xlu0 %1140  ;;  %v1690_v36 = vsel %vm1689_vm8, %v1657_v51, %v1363_v61 }
 0x266   : > { %2380 = vmatmul.msk.f32.vlgmr.msra.gmra.mxu0 %vm1727_vm9, %v1690_v36  ;;  %v1641_v8 = vsel %vm1623_vm5, %v3594_v24, %v1141_v34  ;;  %v1534_v24 = vsel %vm1524_vm2, %v1501_v48, %v4512_v13  ;;  %v2361_v13 = vld [vmem:[%s2499_s14 + $0xda] sm:$0xff] }
 0x267   : > { %v1567_v12 = vsel %vm1557_vm3, %v1534_v24, %v4513_v16  ;;  %v2353_v24 = vld [vmem:[%s2499_s14 + $0x7a] sm:$0xff] }
 0x268   : > { %v1600_v39 = vsel %vm1590_vm4, %v1567_v12, %v4514_v17  ;;  %v4518_v16 = vld [vmem:[#allocation26_spill] sm:$0xff] }
 0x269   : > { %v1633_v0 = vsel %vm1623_vm5, %v1600_v39, %v3845_v15 }
 0x26a   : > { %1260 = vrot.lane.b32.xlu2 %v2328_v32, %s2468_s21  ;;  %1244 = vrot.lane.b32.xlu1 %v2320_v41, %s2468_s21  ;;  %v2312_v32 = vld [vmem:[%s2499_s14 + $0x188] sm:$0xff]  ;;  %v2369_v41 = vld [vmem:[%s2499_s14 + $0x13a] sm:$0xff] }
 0x26b   : > { %1162 = vrot.lane.b32.xlu0 %v2311_v7, %s2467_s20  ;;  %v4517_v7 = vld [vmem:[#allocation24_spill] sm:$0xff] }
 0x26c   : > { %v1399_v46 = vpop.permute.xlu2 %1398  ;;  %v1397_v60 = vpop.permute.xlu1 %1396 }
 0x26d   : > { %v1269_v23 = vpop.permute.xlu0 %1268 }
 0x26e   : > { %v1674_v3 = vsel %vm1656_vm7, %v1641_v8, %v1269_v23 }
 0x26f   : > { %v1707_v14 = vsel %vm1689_vm8, %v1674_v3, %v1397_v60 }
 0x270   : > { %2397 = vmatmul.msk.f32.gmra.mxu2 %vm1727_vm9, %v1707_v14 }
 0x272   : > { %1372 = vrot.lane.b32.xlu2 %v2352_v38, %s2469_s22  ;;  %1150 = vrot.lane.b32.xlu1 %v2305_v29, %s2467_s20  ;;  %v2453_v38 = vld [vmem:[%s2499_s14 + $0x189] sm:$0xff] }
 0x273   : > { %1290 = vrot.lane.b32.xlu0 %v4515_v25, %s2468_s21  ;;  %v2298_v25 = vld [vmem:[%s2499_s14 + $0xe0] sm:$0xff] }
 0x274   : > { %v3971_v10 = vpop.permute.xlu2 %1254  ;;  %v1253_v58 = vpop.permute.xlu1 %1252 }
 0x275   : > { %v1666_v52 = vsel %vm1656_vm7, %v1633_v0, %v1253_v58  ;;  %v1237_v4 = vpop.permute.xlu0 %1236  ;;  %v2338_v0 = vld [vmem:[%s2499_s14 + $0x141] sm:$0xff] }
 0x276   : > { %v1699_v45 = vsel %vm1689_vm8, %v1666_v52, %v1381_v35  ;;  %v1658_v15 = vsel %vm1656_vm7, %v3652_v44, %v1237_v4  ;;  %v2321_v35 = vld [vmem:[%s2499_s14 + $0x79] sm:$0xff]  ;;  %v1648_v44 = vsel %vm1623_vm5, %v3557_v5, %v3899_v1 }
 0x277   : > { %2389 = vmatmul.msk.f32.gmra.mxu1 %vm1727_vm9, %v1699_v45  ;;  %v1681_v3 = vsel %vm1656_vm7, %v1648_v44, %v3914_v57  ;;  %v2306_v5 = vld [vmem:[%s2499_s14 + $0x140] sm:$0xff] }
 0x278   : > { %v2329_v1 = vld [vmem:[%s2499_s14 + $0xd9] sm:$0xff] }
 0x279   : > { %v2345_v44 = vld [vmem:[%s2499_s14 + $0x199] sm:$0xff] }
 0x27a   : > { %1278 = vrot.lane.b32.xlu2 %v2337_v56, %s2468_s21  ;;  %1418 = vrot.lane.b32.xlu1 %v4516_v18, %s2469_s22  ;;  %v1667_v56 = vsel %vm1656_vm7, %v3773_v9, %v3971_v10 }
 0x27b   : > { %1388 = vrot.lane.b32.xlu0 %v2360_v55, %s2469_s22 }
 0x27c   : > { %v1367_v51 = vpop.permute.xlu2 %1366  ;;  %v1365_v61 = vpop.permute.xlu1 %1364 }
 0x27d   : > { %v1143_v34 = vpop.permute.xlu0 %1142  ;;  %v1691_v36 = vsel %vm1689_vm8, %v1658_v15, %v1365_v61  ;;  %v2313_v61 = vld [vmem:[%s2499_s14 + $0x198] sm:$0xff] }
 0x27e   : > { %2381 = vmatmul.msk.f32.gmra.mxu0 %vm1727_vm9, %v1691_v36  ;;  %v1642_v60 = vsel %vm1623_vm5, %v4517_v7, %v1143_v34 }
 0x282   : > { %1246 = vrot.lane.b32.xlu2 %v2321_v35, %s2468_s21  ;;  %1164 = vrot.lane.b32.xlu1 %v2312_v32, %s2467_s20 }
 0x283   : > { %1406 = vrot.lane.b32.xlu0 %v2369_v41, %s2469_s22  ;;  %v2362_v41 = vld [vmem:[%s2499_s14 + $0xe2] sm:$0xff] }
 0x284   : > { %v1273_v8 = vpop.permute.xlu2 %1272  ;;  %v1271_v23 = vpop.permute.xlu1 %1270 }
 0x285   : > { %v1675_v37 = vsel %vm1656_vm7, %v1642_v60, %v1271_v23  ;;  %v1411_v31 = vpop.permute.xlu0 %1410 }
 0x286   : > { %v1714_v28 = vsel %vm1689_vm8, %v1681_v3, %v1411_v31  ;;  %v1708_v14 = vsel %vm1689_vm8, %v1675_v37, %v1399_v46  ;;  %v2314_v31 = vld [vmem:[%s2499_s14 + $0x1a0] sm:$0xff] }
 0x287   : > { %2404 = vmatmul.msk.f32.vlgmr.msra.gmra.mxu3 %vm1727_vm9, %v1714_v28  ;;  %2398 = vmatmul.msk.f32.gmra.mxu2 %vm1727_vm9, %v1708_v14  ;;  %v2346_v28 = vld [vmem:[%s2499_s14 + $0x1a1] sm:$0xff] }
 0x288   : > { %v2377_v14 = vld [vmem:[%s2499_s14 + $0x19a] sm:$0xff] }
 0x28a   : > { %1152 = vrot.lane.b32.xlu2 %v2306_v5, %s2467_s20  ;;  %1292 = vrot.lane.b32.xlu1 %v2453_v38, %s2468_s21 }
 0x28b   : > { %1262 = vrot.lane.b32.xlu0 %v2329_v1, %s2468_s21 }
 0x28c   : > { %v4010_v57 = vpop.permute.xlu2 %1240  ;;  %v1239_v46 = vpop.permute.xlu1 %1238 }
 0x28d   : > { %v1659_v29 = vsel %vm1656_vm7, %v3798_v19, %v1239_v46  ;;  %v1157_v6 = vpop.permute.xlu0 %1156  ;;  %v2370_v19 = vld [vmem:[%s2499_s14 + $0x142] sm:$0xff]  ;;  %v1660_v38 = vsel %vm1656_vm7, %v3794_v42, %v4010_v57 }
 0x28e   : > { %v1692_v48 = vsel %vm1689_vm8, %v1659_v29, %v1367_v51  ;;  %v1649_v58 = vsel %vm1623_vm5, %v3695_v53, %v1157_v6  ;;  %v2330_v53 = vld [vmem:[%s2499_s14 + $0xe1] sm:$0xff] }
 0x28f   : > { %2382 = vmatmul.msk.f32.gmra.mxu0 %vm1727_vm9, %v1692_v48  ;;  %v2322_v51 = vld [vmem:[%s2499_s14 + $0x81] sm:$0xff] }
 0x290   : > { %v2378_v48 = vld [vmem:[%s2499_s14 + $0x1a2] sm:$0xff] }
 0x292   : > { %1420 = vrot.lane.b32.xlu2 %v4518_v16, %s2469_s22  ;;  %1390 = vrot.lane.b32.xlu1 %v2361_v13, %s2469_s22 }
 0x293   : > { %1374 = vrot.lane.b32.xlu0 %v2353_v24, %s2469_s22 }
 0x294   : > { %v4022_v12 = vpop.permute.xlu2 %1146  ;;  %v1145_v17 = vpop.permute.xlu1 %1144 }
 0x295   : > { %v1285_v39 = vpop.permute.xlu0 %1284  ;;  %v1643_v34 = vsel %vm1623_vm5, %v3624_v54, %v1145_v17  ;;  %v2354_v54 = vld [vmem:[%s2499_s14 + $0x82] sm:$0xff]  ;;  %v1644_v24 = vsel %vm1623_vm5, %v3620_v62, %v4022_v12 }
 0x296   : > { %v1682_v52 = vsel %vm1656_vm7, %v1649_v58, %v1285_v39  ;;  %v1676_v35 = vsel %vm1656_vm7, %v1643_v34, %v1273_v8 }
 0x29a   : > { %1136 = vrot.lane.b32.xlu2 %v2298_v25, %s2467_s20  ;;  %1408 = vrot.lane.b32.xlu1 %v2370_v19, %s2469_s22 }
 0x29b   : > { %1280 = vrot.lane.b32.xlu0 %v2338_v0, %s2468_s21 }
 0x29c   : > { %v1415_v4 = vpop.permute.xlu2 %1414  ;;  %v1413_v45 = vpop.permute.xlu1 %1412 }
 0x29d   : > { %v1383_v55 = vpop.permute.xlu0 %1382  ;;  %v1715_v18 = vsel %vm1689_vm8, %v1682_v52, %v1413_v45 }
 0x29e   : > { %v1700_v15 = vsel %vm1689_vm8, %v1667_v56, %v1383_v55  ;;  %2405 = vmatmul.msk.f32.gmra.mxu3 %vm1727_vm9, %v1715_v18  ;;  %v4519_v56 = vld [vmem:[#allocation34_spill] sm:$0xff] }
 0x29f   : > { %2390 = vmatmul.msk.f32.gmra.mxu1 %vm1727_vm9, %v1700_v15 }
 0x2a2   : > { %1264 = vrot.lane.b32.xlu2 %v2330_v53, %s2468_s21  ;;  %1248 = vrot.lane.b32.xlu1 %v2322_v51, %s2468_s21 }
 0x2a3   : > { %1166 = vrot.lane.b32.xlu0 %v2313_v61, %s2467_s20 }
 0x2a4   : > { %v1161_v9 = vpop.permute.xlu2 %1160  ;;  %v1159_v10 = vpop.permute.xlu1 %1158 }
 0x2a5   : > { %v1401_v36 = vpop.permute.xlu0 %1400  ;;  %v1650_v7 = vsel %vm1623_vm5, %v3691_v49, %v1159_v10  ;;  %v1651_v45 = vsel %vm1623_vm5, %v3591_v26, %v1161_v9 }
 0x2a6   : > { %v1709_v32 = vsel %vm1689_vm8, %v1676_v35, %v1401_v36 }
 0x2a7   : > { %2399 = vmatmul.msk.f32.gmra.mxu2 %vm1727_vm9, %v1709_v32 }
 0x2aa   : > { %1392 = vrot.lane.b32.xlu2 %v2362_v41, %s2469_s22  ;;  %1376 = vrot.lane.b32.xlu1 %v2354_v54, %s2469_s22 }
 0x2ab   : > { %1294 = vrot.lane.b32.xlu0 %v2345_v44, %s2468_s21 }
 0x2ac   : > { %v1289_v60 = vpop.permute.xlu2 %1288  ;;  %v1287_v8 = vpop.permute.xlu1 %1286 }
 0x2ad   : > { %v1683_v23 = vsel %vm1656_vm7, %v1650_v7, %v1287_v8  ;;  %v1257_v3 = vpop.permute.xlu0 %1256  ;;  %v1684_v15 = vsel %vm1656_vm7, %v1651_v45, %v1289_v60 }
 0x2ae   : > { %v1716_v37 = vsel %vm1689_vm8, %v1683_v23, %v1415_v4  ;;  %v1668_v49 = vsel %vm1656_vm7, %v3890_v20, %v1257_v3 }
 0x2af   : > { %2406 = vmatmul.msk.f32.gmra.mxu3 %vm1727_vm9, %v1716_v37 }
 0x2b2   : > { %1168 = vrot.lane.b32.xlu1 %v2314_v31, %s2467_s20  ;;  %1296 = vrot.lane.b32.xlu2 %v2346_v28, %s2468_s21 }
 0x2b3   : > { %1422 = vrot.lane.b32.xlu0 %v2377_v14, %s2469_s22 }
 0x2b4   : > { %v1387_v5 = vpop.permute.xlu2 %1386  ;;  %v1385_v1 = vpop.permute.xlu1 %1384 }
 0x2b5   : > { %v1369_v46 = vpop.permute.xlu0 %1368  ;;  %v1701_v29 = vsel %vm1689_vm8, %v1668_v49, %v1385_v1 }
 0x2b6   : > { %v1693_v6 = vsel %vm1689_vm8, %v1660_v38, %v1369_v46  ;;  %2391 = vmatmul.msk.f32.gmra.mxu1 %vm1727_vm9, %v1701_v29 }
 0x2b7   : > { %2383 = vmatmul.msk.f32.gmra.mxu0 %vm1727_vm9, %v1693_v6 }
 0x2bb   : > { %1424 = vrot.lane.b32.xlu0 %v2378_v48, %s2469_s22 }
 0x2bc   : > { %v1405_v13 = vpop.permute.xlu2 %1404  ;;  %v1403_v20 = vpop.permute.xlu1 %1402 }
 0x2bd   : > { %v1275_v16 = vpop.permute.xlu0 %1274 }
 0x2be   : > { %v1677_v42 = vsel %vm1656_vm7, %v1644_v24, %v1275_v16  ;;  %v4520_v16 = vld [vmem:[#allocation30_spill] sm:$0xff] }
 0x2bf   : > { %v1710_v57 = vsel %vm1689_vm8, %v1677_v42, %v1403_v20 }
 0x2c0   : > { %2400 = vmatmul.msk.f32.gmra.mxu2 %vm1727_vm9, %v1710_v57 }
 0x2c4   : > { %v1261_v17 = vpop.permute.xlu2 %1260  ;;  %v1259_v39 = vpop.permute.xlu1 %1258 }
 0x2c5   : > { %v1669_v25 = vsel %vm1656_vm7, %v3886_v43, %v1259_v39  ;;  %v1243_v19 = vpop.permute.xlu0 %1242  ;;  %v1670_v8 = vsel %vm1656_vm7, %v3790_v40, %v1261_v17 }
 0x2c6   : > { %v1702_v0 = vsel %vm1689_vm8, %v1669_v25, %v1387_v5  ;;  %v1661_v62 = vsel %vm1656_vm7, %v3688_v63, %v1243_v19 }
 0x2c7   : > { %2392 = vmatmul.msk.f32.gmra.mxu1 %vm1727_vm9, %v1702_v0 }
 0x2cc   : > { %v1373_v12 = vpop.permute.xlu2 %1372  ;;  %v1371_v58 = vpop.permute.xlu1 %1370 }
 0x2cd   : > { %v1149_v52 = vpop.permute.xlu0 %1148  ;;  %v1694_v4 = vsel %vm1689_vm8, %v1661_v62, %v1371_v58 }
 0x2ce   : > { %2384 = vmatmul.msk.f32.gmra.mxu0 %vm1727_vm9, %v1694_v4  ;;  %v1645_v43 = vsel %vm1623_vm5, %v4519_v56, %v1149_v52 }
 0x2d4   : > { %v1279_v55 = vpop.permute.xlu2 %1278  ;;  %v1277_v18 = vpop.permute.xlu1 %1276 }
 0x2d5   : > { %v1678_v53 = vsel %vm1656_vm7, %v1645_v43, %v1277_v18  ;;  %v1417_v63 = vpop.permute.xlu0 %1416 }
 0x2d6   : > { %v1717_v51 = vsel %vm1689_vm8, %v1684_v15, %v1417_v63  ;;  %v1711_v61 = vsel %vm1689_vm8, %v1678_v53, %v1405_v13 }
 0x2d7   : > { %2407 = vmatmul.msk.f32.gmra.mxu3 %vm1727_vm9, %v1717_v51  ;;  %2401 = vmatmul.msk.f32.gmra.mxu2 %vm1727_vm9, %v1711_v61 }
 0x2dc   : > { %v1247_v34 = vpop.permute.xlu2 %1246  ;;  %v1245_v26 = vpop.permute.xlu1 %1244 }
 0x2dd   : > { %v1662_v9 = vsel %vm1656_vm7, %v3834_v50, %v1245_v26  ;;  %v1163_v10 = vpop.permute.xlu0 %1162  ;;  %v1663_v48 = vsel %vm1656_vm7, %v3831_v33, %v1247_v34 }
 0x2de   : > { %v1695_v36 = vsel %vm1689_vm8, %v1662_v9, %v1373_v12  ;;  %v1652_v54 = vsel %vm1623_vm5, %v3742_v30, %v1163_v10  ;;  %v4162_v9 = vpop.f32.mrf.mxu1 }
 0x2df   : > { %2385 = vmatmul.msk.f32.gmra.mxu0 %vm1727_vm9, %v1695_v36 }
 0x2e3   : > { %v1845_v51 = vpop.f32.mrf.mxu0 }
 0x2e4   : > { %v1153_v35 = vpop.permute.xlu2 %1152  ;;  %v1151_v32 = vpop.permute.xlu1 %1150 }
 0x2e5   : > { %v1291_v41 = vpop.permute.xlu0 %1290  ;;  %v1646_v37 = vsel %vm1623_vm5, %v3659_v47, %v1151_v32  ;;  %v1647_v17 = vsel %vm1623_vm5, %v3655_v22, %v1153_v35 }
 0x2e6   : > { %v1685_v44 = vsel %vm1656_vm7, %v1652_v54, %v1291_v41  ;;  %v1679_v28 = vsel %vm1656_vm7, %v1646_v37, %v1279_v55 }
 0x2ec   : > { %v1421_v7 = vpop.permute.xlu2 %1420  ;;  %v1419_v60 = vpop.permute.xlu1 %1418 }
 0x2ed   : > { %v1389_v23 = vpop.permute.xlu0 %1388  ;;  %v1718_v50 = vsel %vm1689_vm8, %v1685_v44, %v1419_v60 }
 0x2ee   : > { %v1703_v3 = vsel %vm1689_vm8, %v1670_v8, %v1389_v23  ;;  %2408 = vmatmul.msk.f32.gmra.mxu3 %vm1727_vm9, %v1718_v50  ;;  %v1939_v50 = vmax.f32 %v1845_v51, 0.0 }
 0x2ef   : > { %2393 = vmatmul.msk.f32.gmra.mxu1 %vm1727_vm9, %v1703_v3 }
 0x2f4   : > { %v1165_v30 = vpop.permute.xlu1 %1164  ;;  %v1137_v14 = vpop.permute.xlu2 %1136 }
 0x2f5   : > { %v1407_v31 = vpop.permute.xlu0 %1406  ;;  %v1653_v40 = vsel %vm1623_vm5, %v3736_v2, %v1165_v30  ;;  %v1639_v42 = vsel %vm1623_vm5, %v4520_v16, %v1137_v14 }
 0x2f6   : > { %v1712_v49 = vsel %vm1689_vm8, %v1679_v28, %v1407_v31 }
 0x2f7   : > { %2402 = vmatmul.msk.f32.gmra.mxu2 %vm1727_vm9, %v1712_v49 }
 0x2fb   : > { %v1848_v34 = vpop.f32.mrf.mxu0 }
 0x2fc   : > { %v1293_v5 = vpop.permute.xlu1 %1292  ;;  %v1265_v47 = vpop.permute.xlu2 %1264  ;;  %v1940_v28 = vmax.f32 %v1848_v34, 0.0 }
 0x2fd   : > { %v1686_v1 = vsel %vm1656_vm7, %v1653_v40, %v1293_v5  ;;  %v1263_v38 = vpop.permute.xlu0 %1262  ;;  %v1672_v57 = vsel %vm1656_vm7, %v1639_v42, %v1265_v47 }
 0x2fe   : > { %v1719_v46 = vsel %vm1689_vm8, %v1686_v1, %v1421_v7  ;;  %v1671_v29 = vsel %vm1656_vm7, %v3903_v27, %v1263_v38 }
 0x2ff   : > { %2409 = vmatmul.msk.f32.gmra.mxu3 %vm1727_vm9, %v1719_v46 }
 0x304   : > { %v1391_v6 = vpop.permute.xlu1 %1390  ;;  %v1393_v24 = vpop.permute.xlu2 %1392 }
 0x305   : > { %v1375_v13 = vpop.permute.xlu0 %1374  ;;  %v1704_v20 = vsel %vm1689_vm8, %v1671_v29, %v1391_v6  ;;  %v1705_v39 = vsel %vm1689_vm8, %v1672_v57, %v1393_v24 }
 0x306   : > { %v1696_v2 = vsel %vm1689_vm8, %v1663_v48, %v1375_v13  ;;  %2394 = vmatmul.msk.f32.gmra.mxu1 %vm1727_vm9, %v1704_v20 }
 0x307   : > { %2386 = vmatmul.msk.f32.gmra.mxu0 %vm1727_vm9, %v1696_v2 }
 0x30a   : > { %v4178_v14 = vpop.f32.mrf.mxu3 }
 0x30c   : > { %v1409_v27 = vpop.permute.xlu1 %1408  ;;  %v1297_v18 = vpop.permute.xlu2 %1296 }
 0x30d   : > { %v1281_v33 = vpop.permute.xlu0 %1280  ;;  %v1851_v10 = vpop.f32.mrf.mxu0 }
 0x30e   : > { %v1680_v25 = vsel %vm1656_vm7, %v1647_v17, %v1281_v33  ;;  %2395 = vmatmul.msk.f32.gmra.mxu1 %vm1727_vm9, %v1705_v39  ;;  %v1941_v60 = vmax.f32 %v1851_v10, 0.0 }
 0x30f   : > { %v1713_v19 = vsel %vm1689_vm8, %v1680_v25, %v1409_v27 }
 0x310   : > { %2403 = vmatmul.msk.f32.gmra.mxu2 %vm1727_vm9, %v1713_v19  ;;  %v1969_v40 = vmax.f32 %v1939_v50, %v1941_v60 }
 0x314   : > { %v1249_v0 = vpop.permute.xlu1 %1248 }
 0x315   : > { %v1167_v62 = vpop.permute.xlu0 %1166  ;;  %v1664_v12 = vsel %vm1656_vm7, %v3733_v59, %v1249_v0 }
 0x316   : > { %v1654_v4 = vsel %vm1623_vm5, %v3617_v21, %v1167_v62  ;;  %v4158_v21 = vpop.f32.mrf.mxu2 }
 0x317   : > { %v1955_v7 = vmax.f32 %v4158_v21, 0.0 }
 0x31c   : > { %v1377_v58 = vpop.permute.xlu1 %1376 }
 0x31d   : > { %v1295_v52 = vpop.permute.xlu0 %1294  ;;  %v1697_v22 = vsel %vm1689_vm8, %v1664_v12, %v1377_v58 }
 0x31e   : > { %2387 = vmatmul.msk.f32.gmra.mxu0 %vm1727_vm9, %v1697_v22  ;;  %v1687_v45 = vsel %vm1656_vm7, %v1654_v4, %v1295_v52  ;;  %v4160_v61 = vpop.f32.mrf.mxu2 }
 0x31f   : > { %v1956_v3 = vmax.f32 %v4160_v61, 0.0 }
 0x321   : > { %v4198_v39 = vpop.f32.mrf.mxu3 }
 0x324   : > { %v1169_v55 = vpop.permute.xlu1 %1168 }
 0x325   : > { %v1423_v56 = vpop.permute.xlu0 %1422  ;;  %v1655_v59 = vsel %vm1623_vm5, %v3780_v11, %v1169_v55  ;;  %v4164_v11 = vpop.f32.mrf.mxu1 }
 0x326   : > { %v1720_v43 = vsel %vm1689_vm8, %v1687_v45, %v1423_v56  ;;  %v1688_v15 = vsel %vm1656_vm7, %v1655_v59, %v1297_v18  ;;  %v1899_v26 = vpop.f32.mrf.mxu2  ;;  %v1947_v18 = vmax.f32 %v4162_v9, 0.0  ;;  %v1948_v51 = vmax.f32 %v4164_v11, 0.0 }
 0x327   : > { %2410 = vmatmul.msk.f32.gmra.mxu3 %vm1727_vm9, %v1720_v43  ;;  %v1957_v44 = vmax.f32 %v1899_v26, 0.0 }
 0x329   : > { %v1977_v37 = vmax.f32 %v1955_v7, %v1957_v44 }
 0x32d   : > { %v1425_v53 = vpop.permute.xlu0 %1424  ;;  %v4168_v41 = vpop.f32.mrf.mxu1 }
 0x32e   : > { %v1721_v63 = vsel %vm1689_vm8, %v1688_v15, %v1425_v53  ;;  %v1902_v36 = vpop.f32.mrf.mxu2  ;;  %v1949_v59 = vmax.f32 %v4168_v41, 0.0 }
 0x32f   : > { %2411 = vmatmul.msk.f32.gmra.mxu3 %vm1727_vm9, %v1721_v63  ;;  %v1958_v8 = vmax.f32 %v1902_v36, 0.0 }
 0x330   : > { %v1973_v34 = vmax.f32 %v1947_v18, %v1949_v59 }
 0x331   : > { %v1978_v5 = vmax.f32 %v1956_v3, %v1958_v8 }
 0x332   : > { %v1923_v63 = vpop.f32.mrf.mxu3 }
 0x334   : > { %v1854_v35 = vpop.f32.mrf.mxu0 }
 0x335   : > { %v1942_v30 = vmax.f32 %v1854_v35, 0.0  ;;  %v1878_v46 = vpop.f32.mrf.mxu1 }
 0x336   : > { %v1950_v15 = vmax.f32 %v1878_v46, 0.0 }
 0x337   : > { %v1970_v29 = vmax.f32 %v1940_v28, %v1942_v30 }
 0x338   : > { %v1974_v10 = vmax.f32 %v1948_v51, %v1950_v15 }
 0x343   : > { %v4166_v32 = vpop.f32.mrf.mxu2 }
 0x344   : > { %v1959_v23 = vmax.f32 %v4166_v32, 0.0  ;;  %v1881_v22 = vpop.f32.mrf.mxu1 }
 0x345   : > { %v1951_v53 = vmax.f32 %v1881_v22, 0.0 }
 0x346   : > { %v1991_v1 = vmax.f32 %v1977_v37, %v1959_v23 }
 0x347   : > { %v1987_v36 = vmax.f32 %v1973_v34, %v1951_v53 }
 0x348   : > { %v2024_v20 = vrot.slane %v1991_v1, 1  ;;  %v2074_v42 = vrot.slane %v1991_v1, 2 }
 0x349   : > { %v2018_v44 = vrot.slane %v1987_v36, 1  ;;  %v2068_v37 = vrot.slane %v1987_v36, 2 }
 0x34b   : > { %v4170_v54 = vpop.f32.mrf.mxu0 }
 0x34c   : > { %v1943_v31 = vmax.f32 %v4170_v54, 0.0 }
 0x34e   : > { %v1983_v6 = vmax.f32 %v1969_v40, %v1943_v31 }
 0x350   : > { %v2012_v57 = vrot.slane %v1983_v6, 1  ;;  %v2062_v25 = vrot.slane %v1983_v6, 2 }
 0x35a   : > { %v4180_v49 = vpop.f32.mrf.mxu2  ;;  %v1926_v50 = vpop.f32.mrf.mxu3 }
 0x35b   : > { %v1960_v38 = vmax.f32 %v4180_v49, 0.0 }
 0x35c   : > { %v4187_v47 = vpop.f32.mrf.mxu0 }
 0x35d   : > { %v1992_v48 = vmax.f32 %v1978_v5, %v1960_v38  ;;  %v1944_v13 = vmax.f32 %v4187_v47, 0.0 }
 0x35f   : > { %v2025_v2 = vrot.slane %v1992_v48, 1  ;;  %v2075_v24 = vrot.slane %v1992_v48, 2  ;;  %v1984_v16 = vmax.f32 %v1970_v29, %v1944_v13 }
 0x361   : > { %v2026_v27 = vsel %vm2011_vm10, %v2024_v20, %v2025_v2  ;;  %v2056_v17 = vmax.f32 %v1992_v48, %v2025_v2  ;;  %v2013_v33 = vrot.slane %v1984_v16, 1  ;;  %v2063_v0 = vrot.slane %v1984_v16, 2 }
 0x362   : > { %v2055_v19 = vmax.f32 %v1991_v1, %v2026_v27  ;;  %v2076_v62 = vsel %vm2061_vm11, %v2074_v42, %v2075_v24  ;;  %v1963_v48 = vmax.f32 %v4178_v14, 0.0  ;;  %v1966_v20 = vmax.f32 %v1926_v50, 0.0 }
 0x363   : > { %v2106_v12 = vmax.f32 %v2056_v17, %v2075_v24  ;;  %v2014_v58 = vsel %vm2011_vm10, %v2012_v57, %v2013_v33  ;;  %v2048_v52 = vmax.f32 %v1984_v16, %v2013_v33  ;;  %v2064_v56 = vsel %vm2061_vm11, %v2062_v25, %v2063_v0 }
 0x364   : > { %v2105_v4 = vmax.f32 %v2055_v19, %v2076_v62  ;;  %v2047_v45 = vmax.f32 %v1983_v6, %v2014_v58  ;;  %v1965_v6 = vmax.f32 %v1923_v63, 0.0  ;;  %v1964_v24 = vmax.f32 %v4198_v39, 0.0 }
 0x365   : > { %2120 = vst [vmem:[%s4203_s8 + $0x48] sm:$0x3f] %v2106_v12  ;;  %v2098_v43 = vmax.f32 %v2048_v52, %v2063_v0 }
 0x366   : > { %2119 = vst [vmem:[%s4203_s8 + $0x40] sm:$0xff] %v2105_v4  ;;  %v2097_v55 = vmax.f32 %v2047_v45, %v2064_v56  ;;  %v1981_v16 = vmax.f32 %v1963_v48, %v1965_v6  ;;  %v1982_v57 = vmax.f32 %v1964_v24, %v1966_v20 }
 0x367   : > { %2112 = vst [vmem:[%s4203_s8 + $0x8] sm:$0x3f] %v2098_v43 }
 0x368   : > { %2111 = vst [vmem:[%s4203_s8] sm:$0xff] %v2097_v55 }
 0x36c   : > { %v1884_v26 = vpop.f32.mrf.mxu1 }
 0x36d   : > { %v1952_v35 = vmax.f32 %v1884_v26, 0.0 }
 0x36f   : > { %v1988_v41 = vmax.f32 %v1974_v10, %v1952_v35 }
 0x371   : > { %v2019_v60 = vrot.slane %v1988_v41, 1  ;;  %v2069_v8 = vrot.slane %v1988_v41, 2  ;;  %v1929_v29 = vpop.f32.mrf.mxu3 }
 0x372   : > { %v1967_v2 = vmax.f32 %v1929_v29, 0.0 }
 0x373   : > { %v2020_v30 = vsel %vm2011_vm10, %v2018_v44, %v2019_v60  ;;  %v2052_v28 = vmax.f32 %v1988_v41, %v2019_v60  ;;  %v2070_v5 = vsel %vm2061_vm11, %v2068_v37, %v2069_v8 }
 0x374   : > { %v2051_v40 = vmax.f32 %v1987_v36, %v2020_v30  ;;  %v1995_v27 = vmax.f32 %v1981_v16, %v1967_v2 }
 0x375   : > { %v2102_v1 = vmax.f32 %v2052_v28, %v2069_v8 }
 0x376   : > { %v2101_v46 = vmax.f32 %v2051_v40, %v2070_v5  ;;  %v2030_v0 = vrot.slane %v1995_v27, 1  ;;  %v2080_v58 = vrot.slane %v1995_v27, 2 }
 0x377   : > { %2116 = vst [vmem:[%s4203_s8 + $0x28] sm:$0x3f] %v2102_v1 }
 0x378   : > { %2115 = vst [vmem:[%s4203_s8 + $0x20] sm:$0xff] %v2101_v46 }
 0x37a   : > { %v1911_v22 = vpop.f32.mrf.mxu2 }
 0x37b   : > { %v1961_v15 = vmax.f32 %v1911_v22, 0.0 }
 0x37d   : > { %v1979_v10 = vmax.f32 %v1959_v23, %v1961_v15 }
 0x382   : > { %v1932_v42 = vpop.f32.mrf.mxu3 }
 0x383   : > { %v1968_v17 = vmax.f32 %v1932_v42, 0.0  ;;  %v1887_v33 = vpop.f32.mrf.mxu1 }
 0x384   : > { %v1953_v19 = vmax.f32 %v1887_v33, 0.0  ;;  %v1863_v44 = vpop.f32.mrf.mxu0 }
 0x385   : > { %v1996_v25 = vmax.f32 %v1982_v57, %v1968_v17  ;;  %v1945_v30 = vmax.f32 %v1863_v44, 0.0 }
 0x386   : > { %v1975_v39 = vmax.f32 %v1951_v53, %v1953_v19 }
 0x387   : > { %v2031_v62 = vrot.slane %v1996_v25, 1  ;;  %v2081_v12 = vrot.slane %v1996_v25, 2  ;;  %v1971_v5 = vmax.f32 %v1943_v31, %v1945_v30 }
 0x388   : > { %v1989_v63 = vmax.f32 %v1975_v39, %v1955_v7  ;;  %v1993_v7 = vmax.f32 %v1979_v10, %v1963_v48 }
 0x389   : > { %v2032_v14 = vsel %vm2011_vm10, %v2030_v0, %v2031_v62  ;;  %v2060_v52 = vmax.f32 %v1996_v25, %v2031_v62  ;;  %v2082_v45 = vsel %vm2061_vm11, %v2080_v58, %v2081_v12 }
 0x38a   : > { %v2059_v4 = vmax.f32 %v1995_v27, %v2032_v14  ;;  %v2021_v53 = vrot.slane %v1989_v63, 1  ;;  %v2071_v8 = vrot.slane %v1989_v63, 2  ;;  %v2027_v40 = vrot.slane %v1993_v7, 1 }
 0x38b   : > { %v2110_v56 = vmax.f32 %v2060_v52, %v2081_v12  ;;  %v1890_v43 = vpop.f32.mrf.mxu1  ;;  %v2077_v6 = vrot.slane %v1993_v7, 2 }
 0x38c   : > { %v2109_v55 = vmax.f32 %v2059_v4, %v2082_v45  ;;  %v1954_v59 = vmax.f32 %v1890_v43, 0.0 }
 0x38d   : > { %2124 = vst [vmem:[%s4203_s8 + $0x68] sm:$0x3f] %v2110_v56 }
 0x38e   : > { %2123 = vst [vmem:[%s4203_s8 + $0x60] sm:$0xff] %v2109_v55  ;;  %v1976_v34 = vmax.f32 %v1952_v35, %v1954_v59 }
 0x390   : > { %v1990_v26 = vmax.f32 %v1976_v34, %v1956_v3 }
 0x392   : > { %v2022_v36 = vrot.slane %v1990_v26, 1  ;;  %v2072_v41 = vrot.slane %v1990_v26, 2 }
 0x393   : > { %v1914_v60 = vpop.f32.mrf.mxu2 }
 0x394   : > { %v2023_v50 = vsel %vm2011_vm10, %v2021_v53, %v2022_v36  ;;  %v2054_v37 = vmax.f32 %v1990_v26, %v2022_v36  ;;  %v1962_v21 = vmax.f32 %v1914_v60, 0.0  ;;  %v2073_v61 = vsel %vm2061_vm11, %v2071_v8, %v2072_v41 }
 0x395   : > { %v2053_v35 = vmax.f32 %v1989_v63, %v2023_v50 }
 0x396   : > { %v2104_v3 = vmax.f32 %v2054_v37, %v2072_v41  ;;  %v1980_v32 = vmax.f32 %v1960_v38, %v1962_v21  ;;  %v1985_v38 = vmax.f32 %v1971_v5, %v1947_v18 }
 0x397   : > { %v2103_v23 = vmax.f32 %v2053_v35, %v2073_v61 }
 0x398   : > { %2118 = vst [vmem:[%s4203_s8 + $0x38] sm:$0x3f] %v2104_v3  ;;  %v1994_v28 = vmax.f32 %v1980_v32, %v1964_v24  ;;  %v2015_v57 = vrot.slane %v1985_v38, 1  ;;  %v2065_v27 = vrot.slane %v1985_v38, 2 }
 0x399   : > { %2117 = vst [vmem:[%s4203_s8 + $0x30] sm:$0xff] %v2103_v23 }
 0x39a   : > { %v2028_v1 = vrot.slane %v1994_v28, 1  ;;  %v2078_v46 = vrot.slane %v1994_v28, 2 }
 0x39b   : > { %v1866_v29 = vpop.f32.mrf.mxu0 }
 0x39c   : > { %v2029_v48 = vsel %vm2011_vm10, %v2027_v40, %v2028_v1  ;;  %v2058_v20 = vmax.f32 %v1994_v28, %v2028_v1  ;;  %v1946_v2 = vmax.f32 %v1866_v29, 0.0  ;;  %v2079_v24 = vsel %vm2061_vm11, %v2077_v6, %v2078_v46 }
 0x39d   : > { %v2057_v49 = vmax.f32 %v1993_v7, %v2029_v48 }
 0x39e   : > { %v2108_v16 = vmax.f32 %v2058_v20, %v2078_v46  ;;  %v1972_v54 = vmax.f32 %v1944_v13, %v1946_v2 }
 0x39f   : > { %v2107_v31 = vmax.f32 %v2057_v49, %v2079_v24 }
 0x3a0   : > { %2122 = vst [vmem:[%s4203_s8 + $0x58] sm:$0x3f] %v2108_v16  ;;  %v1986_v42 = vmax.f32 %v1972_v54, %v1948_v51 }
 0x3a1   : > { %2121 = vst [vmem:[%s4203_s8 + $0x50] sm:$0xff] %v2107_v31 }
 0x3a2   : > { %v2016_v17 = vrot.slane %v1986_v42, 1  ;;  %v2066_v33 = vrot.slane %v1986_v42, 2 }
 0x3a4   : > { %v2017_v9 = vsel %vm2011_vm10, %v2015_v57, %v2016_v17  ;;  %v2050_v18 = vmax.f32 %v1986_v42, %v2016_v17  ;;  %v2067_v25 = vsel %vm2061_vm11, %v2065_v27, %v2066_v33 }
 0x3a5   : > { %v2049_v19 = vmax.f32 %v1985_v38, %v2017_v9 }
 0x3a6   : > { %v2100_v47 = vmax.f32 %v2050_v18, %v2066_v33 }
 0x3a7   : > { %v2099_v0 = vmax.f32 %v2049_v19, %v2067_v25 }
 0x3a8   : > { %2114 = vst [vmem:[%s4203_s8 + $0x18] sm:$0x3f] %v2100_v47 }
 0x3a9   : > { %2113 = vst [vmem:[%s4203_s8 + $0x10] sm:$0xff] %v2099_v0 }
 0x3aa   : > { %v1935_v13 = vpop.f32.mrf.mxu3 }
 0x3b2   : > { %v1937_v62 = vpop.f32.mrf.mxu3 }
 0x3b3 PF: > { %s12_s9 = sadd.s32 1, %s2460_s9  }
 0x3b4   : > { %p9_p4 = scmp.ge.s32.totalorder %s12_s9, 4  }
 0x3b6   :  { %11 = sbr.rel (!%p9_p4) target bundleno = 1 (0x1), region = 60 }

</bundles_post_ra>
